<compile_context>
chip_gen: v6e
topology: v6e:2x2x1
jax: 0.10.0
libtpu: 0.0.40
codegen_flags: <defaults>
</compile_context>

<pallas_src>
import functools

import jax
import jax.numpy as jnp
from jax.experimental import pallas as pl
from jax.experimental.pallas import tpu as pltpu


# ----------------------------------------------------------------------------- helpers

def _round_up(x, m):
    return ((x + m - 1) // m) * m


def _sublane(dtype):
    # bf16 packs 16 rows per sublane group, f32 packs 8: tile rows to the native pack.
    return 16 if jnp.dtype(dtype) == jnp.dtype(jnp.bfloat16) else 8


@functools.lru_cache(maxsize=None)
def _is_v7x():
    try:
        return "v7" in jax.devices()[0].device_kind.lower()
    except Exception:
        return False


def _mosaic_params():
    # Explicit scoped-VMEM limit: above v5e's 16 MiB default, below v7x's 64 MiB physical.
    limit = (48 if _is_v7x() else 96) * 1024 * 1024
    return pltpu.CompilerParams(dimension_semantics=("parallel",),
                                vmem_limit_bytes=limit)


def _const_spec(shape):
    # Whole-array block whose index never changes across the grid -> single-buffer it
    # (default double-buffering wastes VMEM on weights that are never re-fetched).
    return pl.BlockSpec(shape, lambda i: (0,) * len(shape),
                        pipeline_mode=pl.Buffered(1))


def _conv_output_hw(h, w):
    for k, s in ((8, 4), (4, 2), (3, 1)):
        h = (h - k) // s + 1
        w = (w - k) // s + 1
    return h, w


def _im2col(x, ksize, stride):
    """x: (B,H,W,C) -> (B,Ho,Wo,ksize*ksize*C); patch flattened in (kh, kw, c) order.

    Uses k*k contiguous strided slices + concat (pure copies XLA can fuse) instead of
    an advanced-indexing gather."""
    B, H, W, C = x.shape
    Ho = (H - ksize) // stride + 1
    Wo = (W - ksize) // stride + 1
    slabs = []
    for kh in range(ksize):
        for kw in range(ksize):
            slabs.append(jax.lax.slice(
                x,
                (0, kh, kw, 0),
                (B, kh + (Ho - 1) * stride + 1, kw + (Wo - 1) * stride + 1, C),
                (1, stride, stride, 1)))
    patches = jnp.concatenate(slabs, axis=-1)
    return patches, Ho, Wo


# ----------------------------------------------------------------------------- GEMM kernel

def _linear_kernel(x_ref, w_ref, b_ref, out_ref, *, relu):
    """One row-tile of y = x @ W + b (optionally ReLU). f32 accumulation on the MXU."""
    y = jnp.dot(x_ref[...], w_ref[...], preferred_element_type=jnp.float32) + b_ref[...]
    if relu:
        y = jnp.maximum(y, 0.0)
    out_ref[...] = y.astype(out_ref.dtype)


def _pallas_linear(x, w, b, *, relu, out_dtype, row_tile):
    """Row-tiled fused Linear(+ReLU); output columns are lane-dense (multiple of 128)."""
    M, K = x.shape
    N = w.shape[1]
    N_pad = _round_up(N, 128)
    if N_pad != N:                                   # weights from prepare_params are
        w = jnp.pad(w, ((0, 0), (0, N_pad - N)))     # already lane-dense; this branch
        b = jnp.pad(b, ((0, 0), (0, N_pad - N)))     # is a no-op safety net.

    sub = _sublane(x.dtype)
    mt = _round_up(min(row_tile, M), sub)
    M_pad = _round_up(M, mt)
    if M_pad != M:
        x = jnp.pad(x, ((0, M_pad - M), (0, 0)))     # padded rows produce garbage that
                                                     # is sliced off below.
    out = pl.pallas_call(
        functools.partial(_linear_kernel, relu=relu),
        out_shape=jax.ShapeDtypeStruct((M_pad, N_pad), out_dtype),
        grid=(M_pad // mt,),
        in_specs=[
            pl.BlockSpec((mt, K), lambda i: (i, 0)),
            _const_spec((K, N_pad)),
            _const_spec((1, N_pad)),
        ],
        out_specs=pl.BlockSpec((mt, N_pad), lambda i: (i, 0)),
        compiler_params=_mosaic_params(),
    )(x, w, b)
    return out[:M, :N]


def _conv2d_relu(x_nhwc, w_mat, b, *, ksize, stride, cout, row_tile):
    """VALID conv + ReLU as im2col (wrapper-side layout) + a Pallas MXU GEMM."""
    patches, Ho, Wo = _im2col(x_nhwc, ksize, stride)
    B = x_nhwc.shape[0]
    K = patches.shape[-1]
    y = _pallas_linear(patches.reshape(B * Ho * Wo, K), w_mat, b,
                       relu=True, out_dtype=w_mat.dtype, row_tile=row_tile)
    # TODO(synk): verify in HLO that this channel-unpadding slice fuses into the next
    # layer's patch extraction; if it materializes, extract patches from the padded
    # tensor instead (with zero-padded weight rows).
    return y[:, :cout].reshape(B, Ho, Wo, cout)


# ----------------------------------------------------------------------------- dueling head kernel

def _dueling_head_kernel(x_ref, wfc_ref, bfc_ref, wva1_ref, bva1_ref,
                         wv2_ref, bv2_ref, wa2_ref, ba2_ref, out_ref, *, action_dim):
    """Fused fc + value head + advantage head + dueling aggregation for one batch tile."""
    cd = wfc_ref.dtype
    hh = wv2_ref.shape[1]                    # value/advantage hidden width (256)

    # Shared trunk: Linear(feat, 512) + ReLU.
    h = jnp.dot(x_ref[...], wfc_ref[...], preferred_element_type=jnp.float32) + bfc_ref[...]
    h = jnp.maximum(h, 0.0).astype(cd)

    # Value & advantage hidden layers fused into one N=512 GEMM (fills the 256-wide
    # MXU on v6e/v7x, one push/drain instead of two). Split point is 256-lane aligned.
    va = jnp.dot(h, wva1_ref[...], preferred_element_type=jnp.float32) + bva1_ref[...]
    va = jnp.maximum(va, 0.0)
    vh = va[:, :hh]
    ah = va[:, hh:]

    # Value output dim is 1: VPU multiply + lane reduction instead of a degenerate N=1 matmul.
    v = jnp.sum(vh * wv2_ref[...], axis=-1, keepdims=True) + bv2_ref[...]

    # Advantage output (lane-padded to a multiple of 128).
    a = jnp.dot(ah.astype(cd), wa2_ref[...], preferred_element_type=jnp.float32) + ba2_ref[...]

    # w_a2/b_a2 padding columns are exactly zero (guaranteed by prepare_params), so
    # summing all lanes and dividing by the true action_dim equals mean(A, dim=1).
    a_mean = jnp.sum(a, axis=-1, keepdims=True) * (1.0 / action_dim)

    out_ref[...] = (v + a - a_mean).astype(out_ref.dtype)


def _dueling_head(feats, params, *, action_dim, batch_tile):
    B, F = feats.shape
    Hfc = params["w_fc"].shape[1]
    Hh = params["w_v2"].shape[1]
    a_pad = params["w_a2"].shape[1]          # lane-dense (multiple of 128)

    sub = _sublane(feats.dtype)
    bt = _round_up(min(batch_tile, B), sub)
    # Only v7x has 2 TensorCores: keep >=2 "parallel" grid steps there when the batch
    # allows it. On v5e/v6e an extra step is pure serial overhead, so don't split.
    if _is_v7x() and B >= 2 * sub:
        bt = min(bt, _round_up(pl.cdiv(B, 2), sub))
    B_pad = _round_up(B, bt)

    x = feats
    if B_pad != B:
        x = jnp.pad(x, ((0, B_pad - B), (0, 0)))   # padded rows = garbage; sliced off below

    out = pl.pallas_call(
        functools.partial(_dueling_head_kernel, action_dim=action_dim),
        out_shape=jax.ShapeDtypeStruct((B_pad, a_pad), jnp.float32),
        grid=(B_pad // bt,),
        in_specs=[
            pl.BlockSpec((bt, F), lambda i: (i, 0)),
            _const_spec((F, Hfc)), _const_spec((1, Hfc)),
            _const_spec((Hfc, 2 * Hh)), _const_spec((1, 2 * Hh)),
            _const_spec((1, Hh)), _const_spec((1, 1)),
            _const_spec((Hh, a_pad)), _const_spec((1, a_pad)),
        ],
        out_specs=pl.BlockSpec((bt, a_pad), lambda i: (i, 0)),
        compiler_params=_mosaic_params(),
    )(x,
      params["w_fc"], params["b_fc"],
      params["w_va1"], params["b_va1"],
      params["w_v2"], params["b_v2"],
      params["w_a2"], params["b_a2"])
    # Padded batch rows and padded Q lanes are dropped here — never return `out` raw.
    return out[:B, :action_dim]


# ----------------------------------------------------------------------------- full forward

@functools.partial(jax.jit, static_argnames=("action_dim", "row_tile", "batch_tile"))
def mlp_dueling_qnet_forward(obs, params, *, action_dim, row_tile=512, batch_tile=256):
    """obs: (B, C, H, W) float32 (PyTorch NCHW). params: output of prepare_params().
    Returns (B, action_dim) float32 Q-values."""
    cd = params["w_fc"].dtype
    x = obs.transpose(0, 2, 3, 1).astype(cd)      # NHWC: channels on the lane dim
    x = _conv2d_relu(x, params["w_c1"], params["b_c1"], ksize=8, stride=4, cout=32,
                     row_tile=row_tile)
    x = _conv2d_relu(x, params["w_c2"], params["b_c2"], ksize=4, stride=2, cout=64,
                     row_tile=row_tile)
    x = _conv2d_relu(x, params["w_c3"], params["b_c3"], ksize=3, stride=1, cout=64,
                     row_tile=row_tile)
    # NHWC flatten: w_fc's rows were pre-permuted to match PyTorch's NCHW .view(B,-1),
    # so no activation transpose is needed here.
    feats = x.reshape(x.shape[0], -1)
    return _dueling_head(feats, params, action_dim=action_dim, batch_tile=batch_tile)


# ----------------------------------------------------------------------------- param prep & init

def prepare_params(params, obs_dim, compute_dtype=jnp.bfloat16):
    """One-time (outside jit) weight repacking: cast to the compute dtype, pad heads
    lane-dense, reshape conv filters to GEMM matrices, fold the NCHW flatten into w_fc,
    and fuse the value/advantage hidden layers into one (512,512) weight."""
    cd = compute_dtype
    _, H, W = obs_dim
    ho, wo = _conv_output_hw(H, W)
    action_dim = params["w_a2"].shape[1]
    a_pad = _round_up(action_dim, 128)

    def conv_mat(w):                              # HWIO -> (kh*kw*cin, 128-padded cout)
        kh, kw, cin, cout = w.shape
        m = w.reshape(kh * kw * cin, cout)
        return jnp.pad(m, ((0, 0), (0, _round_up(cout, 128) - cout))).astype(cd)

    def conv_bias(b):
        cout = b.shape[-1]
        return jnp.pad(b.reshape(1, cout),
                       ((0, 0), (0, _round_up(cout, 128) - cout))).astype(jnp.float32)

    # Fold PyTorch's NCHW .view(B,-1) into w_fc: rows reordered from (c,h,w) to (h,w,c).
    n_fc = params["w_fc"].shape[1]
    w_fc = params["w_fc"].reshape(64, ho, wo, n_fc).transpose(1, 2, 0, 3)
    w_fc = w_fc.reshape(64 * ho * wo, n_fc)

    p = {
        "w_c1": conv_mat(params["w_c1"]), "b_c1": conv_bias(params["b_c1"]),
        "w_c2": conv_mat(params["w_c2"]), "b_c2": conv_bias(params["b_c2"]),
        "w_c3": conv_mat(params["w_c3"]), "b_c3": conv_bias(params["b_c3"]),
        "w_fc": w_fc.astype(cd), "b_fc": params["b_fc"].astype(jnp.float32),
        # value/advantage hidden layers fused into one GEMM weight
        "w_va1": jnp.concatenate([params["w_v1"], params["w_a1"]], axis=1).astype(cd),
        "b_va1": jnp.concatenate([params["b_v1"], params["b_a1"]], axis=1).astype(jnp.float32),
        "w_v2": params["w_v2"].reshape(1, -1).astype(jnp.float32),
        "b_v2": params["b_v2"].reshape(1, 1).astype(jnp.float32),
        # lane-dense advantage output; padding columns MUST remain exactly zero
        # (the in-kernel mean(A) relies on it).
        "w_a2": jnp.pad(params["w_a2"], ((0, 0), (0, a_pad - action_dim))).astype(cd),
        "b_a2": jnp.pad(params["b_a2"].reshape(1, -1),
                        ((0, 0), (0, a_pad - action_dim))).astype(jnp.float32),
    }
    return jax.tree_util.tree_map(jnp.asarray, p)


def init_params(key, obs_dim, action_dim):
    """Kaiming-uniform-ish init (like nn.Linear/nn.Conv2d default scale), PyTorch layout
    semantics: conv weights HWIO, linear weights (in, out)."""
    C, H, W = obs_dim
    ho, wo = _conv_output_hw(H, W)
    assert ho >= 1 and wo >= 1, "input spatial size too small for the conv stack"
    feat = 64 * ho * wo

    def conv_init(k, kh, kw, cin, cout):
        bound = 1.0 / (kh * kw * cin) ** 0.5
        kw_, kb_ = jax.random.split(k)
        w = jax.random.uniform(kw_, (kh, kw, cin, cout), jnp.float32, -bound, bound)
        b = jax.random.uniform(kb_, (1, cout), jnp.float32, -bound, bound)
        return w, b

    def lin_init(k, fin, fout):
        bound = 1.0 / fin ** 0.5
        kw_, kb_ = jax.random.split(k)
        w = jax.random.uniform(kw_, (fin, fout), jnp.float32, -bound, bound)
        b = jax.random.uniform(kb_, (1, fout), jnp.float32, -bound, bound)
        return w, b

    keys = jax.random.split(key, 8)
    p = {}
    p["w_c1"], p["b_c1"] = conv_init(keys[0], 8, 8, C, 32)
    p["w_c2"], p["b_c2"] = conv_init(keys[1], 4, 4, 32, 64)
    p["w_c3"], p["b_c3"] = conv_init(keys[2], 3, 3, 64, 64)
    p["w_fc"], p["b_fc"] = lin_init(keys[3], feat, 512)
    p["w_v1"], p["b_v1"] = lin_init(keys[4], 512, 256)
    p["w_v2"], p["b_v2"] = lin_init(keys[5], 256, 1)
    p["w_a1"], p["b_a1"] = lin_init(keys[6], 512, 256)
    p["w_a2"], p["b_a2"] = lin_init(keys[7], 256, action_dim)
    return p


# ----------------------------------------------------------------------------- reference

def _reference_forward(obs, params, compute_dtype=jnp.float32):
    """Plain-JAX reference mirroring the PyTorch MLPDuelingQNet forward (raw params)."""
    cd = compute_dtype
    x = obs.transpose(0, 2, 3, 1)  # NHWC

    def conv(x, w, b, s):
        y = jax.lax.conv_general_dilated(
            x.astype(cd), w.astype(cd), window_strides=(s, s), padding="VALID",
            dimension_numbers=("NHWC", "HWIO", "NHWC"),
            preferred_element_type=jnp.float32)
        return jnp.maximum(y + b.reshape(1, 1, 1, -1).astype(jnp.float32), 0.0)

    def lin(x, w, b):
        return (jnp.dot(x.astype(cd), w.astype(cd), preferred_element_type=jnp.float32)
                + b.astype(jnp.float32))

    x = conv(x, params["w_c1"], params["b_c1"], 4)
    x = conv(x, params["w_c2"], params["b_c2"], 2)
    x = conv(x, params["w_c3"], params["b_c3"], 1)
    feats = x.transpose(0, 3, 1, 2).reshape(x.shape[0], -1)   # PyTorch NCHW flatten

    h = jnp.maximum(lin(feats, params["w_fc"], params["b_fc"]), 0.0)
    v = lin(jnp.maximum(lin(h, params["w_v1"], params["b_v1"]), 0.0),
            params["w_v2"], params["b_v2"])
    a = lin(jnp.maximum(lin(h, params["w_a1"], params["b_a1"]), 0.0),
            params["w_a2"], params["b_a2"])
    return v + a - jnp.mean(a, axis=1, keepdims=True)


# ----------------------------------------------------------------------------- demo

if __name__ == "__main__":
    key = jax.random.PRNGKey(0)
    k_params, k_obs = jax.random.split(key)

    batch = 4
    obs_dim = (4, 36, 36)     # (C, H, W): conv stack reduces 36 -> 8 -> 3 -> 1
    action_dim = 6

    params = init_params(k_params, obs_dim, action_dim)
    obs = jax.random.normal(k_obs, (batch, *obs_dim), jnp.float32)

    # bf16 fast path (default)
    prepped_bf16 = prepare_params(params, obs_dim, jnp.bfloat16)
    q = mlp_dueling_qnet_forward(obs, prepped_bf16, action_dim=action_dim)
    q = jax.block_until_ready(q)
    assert q.shape == (batch, action_dim)
    q_ref = _reference_forward(obs, params, jnp.bfloat16)
    rel = float(jnp.linalg.norm(q - q_ref) / (jnp.linalg.norm(q_ref) + 1e-6))
    assert rel < 2e-2, f"bf16 mismatch vs reference: rel_l2={rel:.3e}"

    # f32 path sanity check (tight tolerance validates the weight repacking exactly)
    prepped_f32 = prepare_params(params, obs_dim, jnp.float32)
    q32 = mlp_dueling_qnet_forward(obs, prepped_f32, action_dim=action_dim)
    q32 = jax.block_until_ready(q32)
    q32_ref = _reference_forward(obs, params, jnp.float32)
    rel32 = float(jnp.linalg.norm(q32 - q32_ref) / (jnp.linalg.norm(q32_ref) + 1e-6))
    assert rel32 < 1e-4, f"f32 mismatch vs reference: rel_l2={rel32:.3e}"

    print("KERNEL_OK")
</pallas_src>

<mosaic_0001>
module attributes {stable_mosaic.version = 11 : i64} {
  func.func @_linear_kernel(%arg0: i32, %arg1: memref<256x256xbf16, #tpu.memory_space<vmem>>, %arg2: memref<256x128xbf16, #tpu.memory_space<vmem>>, %arg3: memref<1x128xf32, #tpu.memory_space<vmem>>, %arg4: memref<256x128xbf16, #tpu.memory_space<vmem>>) attributes {dimension_semantics = [#tpu.dimension_semantics<parallel>], iteration_bounds = array<i64: 1>, scalar_prefetch = 0 : i64, scratch_operands = 0 : i64, tpu.core_type = #tpu.core_type<tc>, window_params = [{transform_indices = @transform_0, window_bounds = array<i64: 256, 256>}, {pipeline_mode = #tpu.pipeline_mode<synchronous>, transform_indices = @transform_1, window_bounds = array<i64: 256, 128>}, {pipeline_mode = #tpu.pipeline_mode<synchronous>, transform_indices = @transform_2, window_bounds = array<i64: 1, 128>}, {transform_indices = @transform_3, window_bounds = array<i64: 256, 128>}]} {
    %c0 = arith.constant 0 : index
    %c0_0 = arith.constant 0 : index
    %0 = vector.load %arg1[%c0, %c0_0] : memref<256x256xbf16, #tpu.memory_space<vmem>>, vector<256x256xbf16>
    %c0_1 = arith.constant 0 : index
    %c0_2 = arith.constant 0 : index
    %1 = vector.load %arg2[%c0_1, %c0_2] : memref<256x128xbf16, #tpu.memory_space<vmem>>, vector<256x128xbf16>
    %cst = arith.constant dense<0.000000e+00> : vector<256x128xf32>
    %2 = tpu.matmul %0, %1, %cst {dimension_numbers = #tpu.dot_dimension_numbers<[1], [0], [0], [1], [0, 0, 1, 1], [], []>} : vector<256x256xbf16>, vector<256x128xbf16>, vector<256x128xf32> -> vector<256x128xf32>
    %c0_3 = arith.constant 0 : index
    %c0_4 = arith.constant 0 : index
    %3 = vector.load %arg3[%c0_3, %c0_4] : memref<1x128xf32, #tpu.memory_space<vmem>>, vector<1x128xf32>
    %4 = vector.broadcast %3 : vector<1x128xf32> to vector<256x128xf32>
    %5 = arith.addf %2, %4 : vector<256x128xf32>
    %cst_5 = arith.constant 0.000000e+00 : f32
    %6 = vector.broadcast %cst_5 : f32 to vector<256x128xf32>
    %7 = arith.maximumf %5, %6 : vector<256x128xf32>
    %8 = arith.truncf %7 : vector<256x128xf32> to vector<256x128xbf16>
    %c0_6 = arith.constant 0 : index
    %c0_7 = arith.constant 0 : index
    %9 = vector.load %arg4[%c0_6, %c0_7] : memref<256x128xbf16, #tpu.memory_space<vmem>>, vector<256x128xbf16>
    tpu.vector_store %arg4[%c0_6, %c0_7], %8 {strides = array<i32>} : memref<256x128xbf16, #tpu.memory_space<vmem>>, vector<256x128xbf16>,
    return
  }
  func.func @transform_0(%arg0: i32) -> (i32, i32) {
    %c0_i32 = arith.constant 0 : i32
    %c0_i32_0 = arith.constant 0 : i32
    return %arg0, %c0_i32 : i32, i32
  }
  func.func @transform_1(%arg0: i32) -> (i32, i32) {
    %c0_i32 = arith.constant 0 : i32
    %c0_i32_0 = arith.constant 0 : i32
    %c0_i32_1 = arith.constant 0 : i32
    return %c0_i32, %c0_i32_0 : i32, i32
  }
  func.func @transform_2(%arg0: i32) -> (i32, i32) {
    %c0_i32 = arith.constant 0 : i32
    %c0_i32_0 = arith.constant 0 : i32
    %c0_i32_1 = arith.constant 0 : i32
    return %c0_i32, %c0_i32_0 : i32, i32
  }
  func.func @transform_3(%arg0: i32) -> (i32, i32) {
    %c0_i32 = arith.constant 0 : i32
    %c0_i32_0 = arith.constant 0 : i32
    return %arg0, %c0_i32 : i32, i32
  }
}

module attributes {stable_mosaic.version = 11 : i64} {
  func.func @_linear_kernel(%arg0: i32, %arg1: memref<48x512xbf16, #tpu.memory_space<vmem>>, %arg2: memref<512x128xbf16, #tpu.memory_space<vmem>>, %arg3: memref<1x128xf32, #tpu.memory_space<vmem>>, %arg4: memref<48x128xbf16, #tpu.memory_space<vmem>>) attributes {dimension_semantics = [#tpu.dimension_semantics<parallel>], iteration_bounds = array<i64: 1>, scalar_prefetch = 0 : i64, scratch_operands = 0 : i64, tpu.core_type = #tpu.core_type<tc>, window_params = [{transform_indices = @transform_0, window_bounds = array<i64: 48, 512>}, {pipeline_mode = #tpu.pipeline_mode<synchronous>, transform_indices = @transform_1, window_bounds = array<i64: 512, 128>}, {pipeline_mode = #tpu.pipeline_mode<synchronous>, transform_indices = @transform_2, window_bounds = array<i64: 1, 128>}, {transform_indices = @transform_3, window_bounds = array<i64: 48, 128>}]} {
    %c0 = arith.constant 0 : index
    %c0_0 = arith.constant 0 : index
    %0 = vector.load %arg1[%c0, %c0_0] : memref<48x512xbf16, #tpu.memory_space<vmem>>, vector<48x512xbf16>
    %c0_1 = arith.constant 0 : index
    %c0_2 = arith.constant 0 : index
    %1 = vector.load %arg2[%c0_1, %c0_2] : memref<512x128xbf16, #tpu.memory_space<vmem>>, vector<512x128xbf16>
    %cst = arith.constant dense<0.000000e+00> : vector<48x128xf32>
    %2 = tpu.matmul %0, %1, %cst {dimension_numbers = #tpu.dot_dimension_numbers<[1], [0], [0], [1], [0, 0, 1, 1], [], []>} : vector<48x512xbf16>, vector<512x128xbf16>, vector<48x128xf32> -> vector<48x128xf32>
    %c0_3 = arith.constant 0 : index
    %c0_4 = arith.constant 0 : index
    %3 = vector.load %arg3[%c0_3, %c0_4] : memref<1x128xf32, #tpu.memory_space<vmem>>, vector<1x128xf32>
    %4 = vector.broadcast %3 : vector<1x128xf32> to vector<48x128xf32>
    %5 = arith.addf %2, %4 : vector<48x128xf32>
    %cst_5 = arith.constant 0.000000e+00 : f32
    %6 = vector.broadcast %cst_5 : f32 to vector<48x128xf32>
    %7 = arith.maximumf %5, %6 : vector<48x128xf32>
    %8 = arith.truncf %7 : vector<48x128xf32> to vector<48x128xbf16>
    %c0_6 = arith.constant 0 : index
    %c0_7 = arith.constant 0 : index
    %9 = vector.load %arg4[%c0_6, %c0_7] : memref<48x128xbf16, #tpu.memory_space<vmem>>, vector<48x128xbf16>
    tpu.vector_store %arg4[%c0_6, %c0_7], %8 {strides = array<i32>} : memref<48x128xbf16, #tpu.memory_space<vmem>>, vector<48x128xbf16>,
    return
  }
  func.func @transform_0(%arg0: i32) -> (i32, i32) {
    %c0_i32 = arith.constant 0 : i32
    %c0_i32_0 = arith.constant 0 : i32
    return %arg0, %c0_i32 : i32, i32
  }
  func.func @transform_1(%arg0: i32) -> (i32, i32) {
    %c0_i32 = arith.constant 0 : i32
    %c0_i32_0 = arith.constant 0 : i32
    %c0_i32_1 = arith.constant 0 : i32
    return %c0_i32, %c0_i32_0 : i32, i32
  }
  func.func @transform_2(%arg0: i32) -> (i32, i32) {
    %c0_i32 = arith.constant 0 : i32
    %c0_i32_0 = arith.constant 0 : i32
    %c0_i32_1 = arith.constant 0 : i32
    return %c0_i32, %c0_i32_0 : i32, i32
  }
  func.func @transform_3(%arg0: i32) -> (i32, i32) {
    %c0_i32 = arith.constant 0 : i32
    %c0_i32_0 = arith.constant 0 : i32
    return %arg0, %c0_i32 : i32, i32
  }
}

module attributes {stable_mosaic.version = 11 : i64} {
  func.func @_linear_kernel(%arg0: i32, %arg1: memref<16x576xbf16, #tpu.memory_space<vmem>>, %arg2: memref<576x128xbf16, #tpu.memory_space<vmem>>, %arg3: memref<1x128xf32, #tpu.memory_space<vmem>>, %arg4: memref<16x128xbf16, #tpu.memory_space<vmem>>) attributes {dimension_semantics = [#tpu.dimension_semantics<parallel>], iteration_bounds = array<i64: 1>, scalar_prefetch = 0 : i64, scratch_operands = 0 : i64, tpu.core_type = #tpu.core_type<tc>, window_params = [{transform_indices = @transform_0, window_bounds = array<i64: 16, 576>}, {pipeline_mode = #tpu.pipeline_mode<synchronous>, transform_indices = @transform_1, window_bounds = array<i64: 576, 128>}, {pipeline_mode = #tpu.pipeline_mode<synchronous>, transform_indices = @transform_2, window_bounds = array<i64: 1, 128>}, {transform_indices = @transform_3, window_bounds = array<i64: 16, 128>}]} {
    %c0 = arith.constant 0 : index
    %c0_0 = arith.constant 0 : index
    %0 = vector.load %arg1[%c0, %c0_0] : memref<16x576xbf16, #tpu.memory_space<vmem>>, vector<16x576xbf16>
    %c0_1 = arith.constant 0 : index
    %c0_2 = arith.constant 0 : index
    %1 = vector.load %arg2[%c0_1, %c0_2] : memref<576x128xbf16, #tpu.memory_space<vmem>>, vector<576x128xbf16>
    %cst = arith.constant dense<0.000000e+00> : vector<16x128xf32>
    %2 = tpu.matmul %0, %1, %cst {dimension_numbers = #tpu.dot_dimension_numbers<[1], [0], [0], [1], [0, 0, 1, 1], [], []>} : vector<16x576xbf16>, vector<576x128xbf16>, vector<16x128xf32> -> vector<16x128xf32>
    %c0_3 = arith.constant 0 : index
    %c0_4 = arith.constant 0 : index
    %3 = vector.load %arg3[%c0_3, %c0_4] : memref<1x128xf32, #tpu.memory_space<vmem>>, vector<1x128xf32>
    %4 = vector.broadcast %3 : vector<1x128xf32> to vector<16x128xf32>
    %5 = arith.addf %2, %4 : vector<16x128xf32>
    %cst_5 = arith.constant 0.000000e+00 : f32
    %6 = vector.broadcast %cst_5 : f32 to vector<16x128xf32>
    %7 = arith.maximumf %5, %6 : vector<16x128xf32>
    %8 = arith.truncf %7 : vector<16x128xf32> to vector<16x128xbf16>
    %c0_6 = arith.constant 0 : index
    %c0_7 = arith.constant 0 : index
    %9 = vector.load %arg4[%c0_6, %c0_7] : memref<16x128xbf16, #tpu.memory_space<vmem>>, vector<16x128xbf16>
    tpu.vector_store %arg4[%c0_6, %c0_7], %8 {strides = array<i32>} : memref<16x128xbf16, #tpu.memory_space<vmem>>, vector<16x128xbf16>,
    return
  }
  func.func @transform_0(%arg0: i32) -> (i32, i32) {
    %c0_i32 = arith.constant 0 : i32
    %c0_i32_0 = arith.constant 0 : i32
    return %arg0, %c0_i32 : i32, i32
  }
  func.func @transform_1(%arg0: i32) -> (i32, i32) {
    %c0_i32 = arith.constant 0 : i32
    %c0_i32_0 = arith.constant 0 : i32
    %c0_i32_1 = arith.constant 0 : i32
    return %c0_i32, %c0_i32_0 : i32, i32
  }
  func.func @transform_2(%arg0: i32) -> (i32, i32) {
    %c0_i32 = arith.constant 0 : i32
    %c0_i32_0 = arith.constant 0 : i32
    %c0_i32_1 = arith.constant 0 : i32
    return %c0_i32, %c0_i32_0 : i32, i32
  }
  func.func @transform_3(%arg0: i32) -> (i32, i32) {
    %c0_i32 = arith.constant 0 : i32
    %c0_i32_0 = arith.constant 0 : i32
    return %arg0, %c0_i32 : i32, i32
  }
}

module attributes {stable_mosaic.version = 11 : i64} {
  func.func @_dueling_head_kernel(%arg0: i32, %arg1: memref<16x64xbf16, #tpu.memory_space<vmem>>, %arg2: memref<64x512xbf16, #tpu.memory_space<vmem>>, %arg3: memref<1x512xf32, #tpu.memory_space<vmem>>, %arg4: memref<512x512xbf16, #tpu.memory_space<vmem>>, %arg5: memref<1x512xf32, #tpu.memory_space<vmem>>, %arg6: memref<1x256xf32, #tpu.memory_space<vmem>>, %arg7: memref<1x1xf32, #tpu.memory_space<vmem>>, %arg8: memref<256x128xbf16, #tpu.memory_space<vmem>>, %arg9: memref<1x128xf32, #tpu.memory_space<vmem>>, %arg10: memref<16x128xf32, #tpu.memory_space<vmem>>) attributes {dimension_semantics = [#tpu.dimension_semantics<parallel>], iteration_bounds = array<i64: 1>, scalar_prefetch = 0 : i64, scratch_operands = 0 : i64, tpu.core_type = #tpu.core_type<tc>, window_params = [{transform_indices = @transform_0, window_bounds = array<i64: 16, 64>}, {pipeline_mode = #tpu.pipeline_mode<synchronous>, transform_indices = @transform_1, window_bounds = array<i64: 64, 512>}, {pipeline_mode = #tpu.pipeline_mode<synchronous>, transform_indices = @transform_2, window_bounds = array<i64: 1, 512>}, {pipeline_mode = #tpu.pipeline_mode<synchronous>, transform_indices = @transform_3, window_bounds = array<i64: 512, 512>}, {pipeline_mode = #tpu.pipeline_mode<synchronous>, transform_indices = @transform_4, window_bounds = array<i64: 1, 512>}, {pipeline_mode = #tpu.pipeline_mode<synchronous>, transform_indices = @transform_5, window_bounds = array<i64: 1, 256>}, {pipeline_mode = #tpu.pipeline_mode<synchronous>, transform_indices = @transform_6, window_bounds = array<i64: 1, 1>}, {pipeline_mode = #tpu.pipeline_mode<synchronous>, transform_indices = @transform_7, window_bounds = array<i64: 256, 128>}, {pipeline_mode = #tpu.pipeline_mode<synchronous>, transform_indices = @transform_8, window_bounds = array<i64: 1, 128>}, {transform_indices = @transform_9, window_bounds = array<i64: 16, 128>}]} {
    %c0 = arith.constant 0 : index
    %c0_0 = arith.constant 0 : index
    %0 = vector.load %arg1[%c0, %c0_0] : memref<16x64xbf16, #tpu.memory_space<vmem>>, vector<16x64xbf16>
    %c0_1 = arith.constant 0 : index
    %c0_2 = arith.constant 0 : index
    %1 = vector.load %arg2[%c0_1, %c0_2] : memref<64x512xbf16, #tpu.memory_space<vmem>>, vector<64x512xbf16>
    %cst = arith.constant dense<0.000000e+00> : vector<16x512xf32>
    %2 = tpu.matmul %0, %1, %cst {dimension_numbers = #tpu.dot_dimension_numbers<[1], [0], [0], [1], [0, 0, 1, 1], [], []>} : vector<16x64xbf16>, vector<64x512xbf16>, vector<16x512xf32> -> vector<16x512xf32>
    %c0_3 = arith.constant 0 : index
    %c0_4 = arith.constant 0 : index
    %3 = vector.load %arg3[%c0_3, %c0_4] : memref<1x512xf32, #tpu.memory_space<vmem>>, vector<1x512xf32>
    %4 = vector.broadcast %3 : vector<1x512xf32> to vector<16x512xf32>
    %5 = arith.addf %2, %4 : vector<16x512xf32>
    %cst_5 = arith.constant 0.000000e+00 : f32
    %6 = vector.broadcast %cst_5 : f32 to vector<16x512xf32>
    %7 = arith.maximumf %5, %6 : vector<16x512xf32>
    %8 = arith.truncf %7 : vector<16x512xf32> to vector<16x512xbf16>
    %c0_6 = arith.constant 0 : index
    %c0_7 = arith.constant 0 : index
    %9 = vector.load %arg4[%c0_6, %c0_7] : memref<512x512xbf16, #tpu.memory_space<vmem>>, vector<512x512xbf16>
    %cst_8 = arith.constant dense<0.000000e+00> : vector<16x512xf32>
    %10 = tpu.matmul %8, %9, %cst_8 {dimension_numbers = #tpu.dot_dimension_numbers<[1], [0], [0], [1], [0, 0, 1, 1], [], []>} : vector<16x512xbf16>, vector<512x512xbf16>, vector<16x512xf32> -> vector<16x512xf32>
    %c0_9 = arith.constant 0 : index
    %c0_10 = arith.constant 0 : index
    %11 = vector.load %arg5[%c0_9, %c0_10] : memref<1x512xf32, #tpu.memory_space<vmem>>, vector<1x512xf32>
    %12 = vector.broadcast %11 : vector<1x512xf32> to vector<16x512xf32>
    %13 = arith.addf %10, %12 : vector<16x512xf32>
    %cst_11 = arith.constant 0.000000e+00 : f32
    %14 = vector.broadcast %cst_11 : f32 to vector<16x512xf32>
    %15 = arith.maximumf %13, %14 : vector<16x512xf32>
    %16 = vector.extract_strided_slice %15 {offsets = [0, 0], sizes = [16, 256], strides = [1, 1]} : vector<16x512xf32> to vector<16x256xf32>
    %17 = vector.extract_strided_slice %15 {offsets = [0, 256], sizes = [16, 256], strides = [1, 1]} : vector<16x512xf32> to vector<16x256xf32>
    %c0_12 = arith.constant 0 : index
    %c0_13 = arith.constant 0 : index
    %18 = vector.load %arg6[%c0_12, %c0_13] : memref<1x256xf32, #tpu.memory_space<vmem>>, vector<1x256xf32>
    %19 = vector.broadcast %18 : vector<1x256xf32> to vector<16x256xf32>
    %20 = arith.mulf %16, %19 : vector<16x256xf32>
    %cst_14 = arith.constant dense<0.000000e+00> : vector<16xf32>
    %21 = vector.multi_reduction <add>, %20, %cst_14 [1] : vector<16x256xf32> to vector<16xf32>
    %22 = vector.shape_cast %21 : vector<16xf32> to vector<16x1xf32>
    %c0_15 = arith.constant 0 : index
    %c0_16 = arith.constant 0 : index
    %23 = vector.load %arg7[%c0_15, %c0_16] : memref<1x1xf32, #tpu.memory_space<vmem>>, vector<1x1xf32>
    %24 = vector.broadcast %23 : vector<1x1xf32> to vector<16x1xf32>
    %25 = arith.addf %22, %24 : vector<16x1xf32>
    %26 = arith.truncf %17 : vector<16x256xf32> to vector<16x256xbf16>
    %c0_17 = arith.constant 0 : index
    %c0_18 = arith.constant 0 : index
    %27 = vector.load %arg8[%c0_17, %c0_18] : memref<256x128xbf16, #tpu.memory_space<vmem>>, vector<256x128xbf16>
    %cst_19 = arith.constant dense<0.000000e+00> : vector<16x128xf32>
    %28 = tpu.matmul %26, %27, %cst_19 {dimension_numbers = #tpu.dot_dimension_numbers<[1], [0], [0], [1], [0, 0, 1, 1], [], []>} : vector<16x256xbf16>, vector<256x128xbf16>, vector<16x128xf32> -> vector<16x128xf32>
    %c0_20 = arith.constant 0 : index
    %c0_21 = arith.constant 0 : index
    %29 = vector.load %arg9[%c0_20, %c0_21] : memref<1x128xf32, #tpu.memory_space<vmem>>, vector<1x128xf32>
    %30 = vector.broadcast %29 : vector<1x128xf32> to vector<16x128xf32>
    %31 = arith.addf %28, %30 : vector<16x128xf32>
    %cst_22 = arith.constant dense<0.000000e+00> : vector<16xf32>
    %32 = vector.multi_reduction <add>, %31, %cst_22 [1] : vector<16x128xf32> to vector<16xf32>
    %33 = vector.shape_cast %32 : vector<16xf32> to vector<16x1xf32>
    %cst_23 = arith.constant 0.166666672 : f32
    %34 = vector.broadcast %cst_23 : f32 to vector<16x1xf32>
    %35 = arith.mulf %33, %34 : vector<16x1xf32>
    %36 = vector.broadcast %25 : vector<16x1xf32> to vector<16x128xf32>
    %37 = arith.addf %36, %31 : vector<16x128xf32>
    %38 = vector.broadcast %35 : vector<16x1xf32> to vector<16x128xf32>
    %39 = arith.subf %37, %38 : vector<16x128xf32>
    %c0_24 = arith.constant 0 : index
    %c0_25 = arith.constant 0 : index
    %40 = vector.load %arg10[%c0_24, %c0_25] : memref<16x128xf32, #tpu.memory_space<vmem>>, vector<16x128xf32>
    tpu.vector_store %arg10[%c0_24, %c0_25], %39 {strides = array<i32>} : memref<16x128xf32, #tpu.memory_space<vmem>>, vector<16x128xf32>,
    return
  }
  func.func @transform_0(%arg0: i32) -> (i32, i32) {
    %c0_i32 = arith.constant 0 : i32
    %c0_i32_0 = arith.constant 0 : i32
    return %arg0, %c0_i32 : i32, i32
  }
  func.func @transform_1(%arg0: i32) -> (i32, i32) {
    %c0_i32 = arith.constant 0 : i32
    %c0_i32_0 = arith.constant 0 : i32
    %c0_i32_1 = arith.constant 0 : i32
    return %c0_i32, %c0_i32_0 : i32, i32
  }
  func.func @transform_2(%arg0: i32) -> (i32, i32) {
    %c0_i32 = arith.constant 0 : i32
    %c0_i32_0 = arith.constant 0 : i32
    %c0_i32_1 = arith.constant 0 : i32
    return %c0_i32, %c0_i32_0 : i32, i32
  }
  func.func @transform_3(%arg0: i32) -> (i32, i32) {
    %c0_i32 = arith.constant 0 : i32
    %c0_i32_0 = arith.constant 0 : i32
    %c0_i32_1 = arith.constant 0 : i32
    return %c0_i32, %c0_i32_0 : i32, i32
  }
  func.func @transform_4(%arg0: i32) -> (i32, i32) {
    %c0_i32 = arith.constant 0 : i32
    %c0_i32_0 = arith.constant 0 : i32
    %c0_i32_1 = arith.constant 0 : i32
    return %c0_i32, %c0_i32_0 : i32, i32
  }
  func.func @transform_5(%arg0: i32) -> (i32, i32) {
    %c0_i32 = arith.constant 0 : i32
    %c0_i32_0 = arith.constant 0 : i32
    %c0_i32_1 = arith.constant 0 : i32
    return %c0_i32, %c0_i32_0 : i32, i32
  }
  func.func @transform_6(%arg0: i32) -> (i32, i32) {
    %c0_i32 = arith.constant 0 : i32
    %c0_i32_0 = arith.constant 0 : i32
    %c0_i32_1 = arith.constant 0 : i32
    return %c0_i32, %c0_i32_0 : i32, i32
  }
  func.func @transform_7(%arg0: i32) -> (i32, i32) {
    %c0_i32 = arith.constant 0 : i32
    %c0_i32_0 = arith.constant 0 : i32
    %c0_i32_1 = arith.constant 0 : i32
    return %c0_i32, %c0_i32_0 : i32, i32
  }
  func.func @transform_8(%arg0: i32) -> (i32, i32) {
    %c0_i32 = arith.constant 0 : i32
    %c0_i32_0 = arith.constant 0 : i32
    %c0_i32_1 = arith.constant 0 : i32
    return %c0_i32, %c0_i32_0 : i32, i32
  }
  func.func @transform_9(%arg0: i32) -> (i32, i32) {
    %c0_i32 = arith.constant 0 : i32
    %c0_i32_0 = arith.constant 0 : i32
    return %arg0, %c0_i32 : i32, i32
  }
}

</mosaic_0001>

<bundles_post_ra>
// kernel: mlp_dueling_qnet_forward.4
= control target key start
LH: loop header
LB: loop body
LE: loop exit
PB: predicated region body
PF: predicated region fallthrough
CT: control target
= control target key end

     0   :  { %s1348_s1 = inlined_call_operand.vmem [shape: bf16[256,128], index: 1, kind: input, shape index: {}]   ;;  %s1349_s0 = inlined_call_operand.vmem [shape: bf16[256,256], index: 0, kind: input, shape index: {}]   ;;  %s1350_s2 = inlined_call_operand.vmem [shape: f32[1,128], index: 2, kind: input, shape index: {}]   ;;  %s1351_s3 = inlined_call_operand.vmem [shape: bf16[256,128], index: 3, kind: output, shape index: {}]  }
   0x1   :  { %v1035_v0 = vld [vmem:[%s1348_s1 + $0x78] sm:$0xff]   ;;  %v1037_v2 = vld [vmem:[%s1348_s1 + $0x70] sm:$0xff]   ;;  %v1039_v4 = vld [vmem:[%s1348_s1 + $0x68] sm:$0xff]  }
   0x2   :  { %v1036_v1 = vld [vmem:[%s1348_s1 + $0x38] sm:$0xff]   ;;  %907 = vmatprep.subr.bf16.mxu0 %v1035_v0  ;;  %1019 = vmatprep.subr.bf16.mxu1 %v1035_v0  ;;  %v1038_v3 = vld [vmem:[%s1348_s1 + $0x30] sm:$0xff]   ;;  %v1040_v5 = vld [vmem:[%s1348_s1 + $0x28] sm:$0xff]  }
   0x3   :  { %908 = vmatpush3.bf16.msra.mxu0 %v1036_v1  ;;  %1027 = vmatpush3.bf16.msra.mxu1 %v1036_v1  ;;  %v1041_v6 = vld [vmem:[%s1348_s1 + $0x60] sm:$0xff]   ;;  %v1043_v8 = vld [vmem:[%s1348_s1 + $0x58] sm:$0xff]   ;;  %v1045_v10 = vld [vmem:[%s1348_s1 + $0x50] sm:$0xff]  }
   0x4   :  { %909 = vmatprep.subr.bf16.mxu0 %v1037_v2  ;;  %1020 = vmatprep.subr.bf16.mxu1 %v1037_v2  ;;  %v1042_v7 = vld [vmem:[%s1348_s1 + $0x20] sm:$0xff]   ;;  %v1044_v9 = vld [vmem:[%s1348_s1 + $0x18] sm:$0xff]   ;;  %v1046_v13 = vld [vmem:[%s1348_s1 + $0x10] sm:$0xff]  }
   0x5   :  { %v1053_v11 = vld [vmem:[%s1349_s0 + $0x4] ss:$8 sps:$4 sm:$0xff]   ;;  %v1051_v18 = vld [vmem:[%s1349_s0] ss:$8 sps:$4 sm:$0xff]   ;;  %v1057_v20 = vld [vmem:[%s1349_s0 + $0x14] ss:$8 sps:$4 sm:$0xff]  }
   0x6   :  { %v1056_v12 = vld [vmem:[%s1349_s0 + $0x84] ss:$8 sps:$4 sm:$0xff]   ;;  %374 = vmatprep.mubr.bf16.mxu0 %v1053_v11  ;;  %v1054_v19 = vld [vmem:[%s1349_s0 + $0x80] ss:$8 sps:$4 sm:$0xff]   ;;  %v1059_v21 = vld [vmem:[%s1349_s0 + $0x94] ss:$8 sps:$4 sm:$0xff]  }
   0x7   :  { %910 = vmatpush3.bf16.msra.mxu0 %v1038_v3  ;;  %1028 = vmatpush3.bf16.msra.mxu1 %v1038_v3  ;;  %v1047_v14 = vld [vmem:[%s1348_s1 + $0x48] sm:$0xff]   ;;  %v1049_v16 = vld [vmem:[%s1348_s1 + $0x40] sm:$0xff]   ;;  %v1061_v22 = vld [vmem:[%s1349_s0 + $0x10] ss:$8 sps:$4 sm:$0xff]  }
   0x8   :  { %911 = vmatprep.subr.bf16.mxu0 %v1039_v4  ;;  %1021 = vmatprep.subr.bf16.mxu1 %v1039_v4  ;;  %v1048_v15 = vld [vmem:[%s1348_s1 + $0x8] sm:$0xff]   ;;  %v1050_v17 = vld [vmem:[%s1348_s1] sm:$0xff]   ;;  %v1062_v23 = vld [vmem:[%s1349_s0 + $0x90] ss:$8 sps:$4 sm:$0xff]  }
   0x9   :  { %438 = vmatprep.mubr.bf16.mxu1 %v1056_v12  ;;  %v1063_v24 = vld [vmem:[%s1349_s0 + $0x24] ss:$8 sps:$4 sm:$0xff]   ;;  %v1067_v26 = vld [vmem:[%s1349_s0 + $0x20] ss:$8 sps:$4 sm:$0xff]   ;;  %v1069_v28 = vld [vmem:[%s1349_s0 + $0x34] ss:$8 sps:$4 sm:$0xff]  }
   0xa   :  { %v1065_v25 = vld [vmem:[%s1349_s0 + $0xa4] ss:$8 sps:$4 sm:$0xff]   ;;  %v1068_v27 = vld [vmem:[%s1349_s0 + $0xa0] ss:$8 sps:$4 sm:$0xff]   ;;  %v1071_v29 = vld [vmem:[%s1349_s0 + $0xb4] ss:$8 sps:$4 sm:$0xff]  }
   0xb   :  { %912 = vmatpush3.bf16.msra.mxu0 %v1040_v5  ;;  %1029 = vmatpush3.bf16.msra.mxu1 %v1040_v5  ;;  %v1073_v30 = vld [vmem:[%s1349_s0 + $0x30] ss:$8 sps:$4 sm:$0xff]   ;;  %v1075_v32 = vld [vmem:[%s1349_s0 + $0x44] ss:$8 sps:$4 sm:$0xff]   ;;  %v1079_v34 = vld [vmem:[%s1349_s0 + $0x40] ss:$8 sps:$4 sm:$0xff]  }
   0xc   :  { %913 = vmatprep.subr.bf16.mxu0 %v1041_v6  ;;  %1022 = vmatprep.subr.bf16.mxu1 %v1041_v6  ;;  %v1074_v31 = vld [vmem:[%s1349_s0 + $0xb0] ss:$8 sps:$4 sm:$0xff]   ;;  %v1077_v33 = vld [vmem:[%s1349_s0 + $0xc4] ss:$8 sps:$4 sm:$0xff]   ;;  %v1080_v35 = vld [vmem:[%s1349_s0 + $0xc0] ss:$8 sps:$4 sm:$0xff]  }
   0xd   :  { %v1081_v36 = vld [vmem:[%s1349_s0 + $0x54] ss:$8 sps:$4 sm:$0xff]   ;;  %v1085_v38 = vld [vmem:[%s1349_s0 + $0x50] ss:$8 sps:$4 sm:$0xff]   ;;  %v1087_v40 = vld [vmem:[%s1349_s0 + $0x64] ss:$8 sps:$4 sm:$0xff]  }
   0xe   :  { %v1083_v37 = vld [vmem:[%s1349_s0 + $0xd4] ss:$8 sps:$4 sm:$0xff]   ;;  %v1086_v39 = vld [vmem:[%s1349_s0 + $0xd0] ss:$8 sps:$4 sm:$0xff]   ;;  %v1089_v41 = vld [vmem:[%s1349_s0 + $0xe4] ss:$8 sps:$4 sm:$0xff]  }
   0xf   :  { %914 = vmatpush3.bf16.msra.mxu0 %v1042_v7  ;;  %1030 = vmatpush3.bf16.msra.mxu1 %v1042_v7  ;;  %v1091_v42 = vld [vmem:[%s1349_s0 + $0x60] ss:$8 sps:$4 sm:$0xff]   ;;  %v1093_v44 = vld [vmem:[%s1349_s0 + $0x74] ss:$8 sps:$4 sm:$0xff]   ;;  %v1097_v46 = vld [vmem:[%s1349_s0 + $0x70] ss:$8 sps:$4 sm:$0xff]  }
  0x10   :  { %915 = vmatprep.subr.bf16.mxu0 %v1043_v8  ;;  %1023 = vmatprep.subr.bf16.mxu1 %v1043_v8  ;;  %v1092_v43 = vld [vmem:[%s1349_s0 + $0xe0] ss:$8 sps:$4 sm:$0xff]   ;;  %v1095_v45 = vld [vmem:[%s1349_s0 + $0xf4] ss:$8 sps:$4 sm:$0xff]   ;;  %v1098_v47 = vld [vmem:[%s1349_s0 + $0xf0] ss:$8 sps:$4 sm:$0xff]  }
  0x11   :  { %v1266_v52 = vld [vmem:[%s1350_s2] ss:$0 sm:$0xff] }
  0x13   :  { %916 = vmatpush3.bf16.msra.mxu0 %v1044_v9  ;;  %1031 = vmatpush3.bf16.msra.mxu1 %v1044_v9 }
  0x14   :  { %917 = vmatprep.subr.bf16.mxu0 %v1045_v10  ;;  %1024 = vmatprep.subr.bf16.mxu1 %v1045_v10 }
  0x17   :  { %918 = vmatpush3.bf16.msra.mxu0 %v1046_v13  ;;  %1032 = vmatpush3.bf16.msra.mxu1 %v1046_v13 }
  0x18   :  { %919 = vmatprep.subr.bf16.mxu0 %v1047_v14  ;;  %1025 = vmatprep.subr.bf16.mxu1 %v1047_v14 }
  0x1b   :  { %920 = vmatpush3.bf16.msra.mxu0 %v1048_v15  ;;  %1033 = vmatpush3.bf16.msra.mxu1 %v1048_v15 }
  0x1c   :  { %921 = vmatprep.subr.bf16.mxu0 %v1049_v16  ;;  %1026 = vmatprep.subr.bf16.mxu1 %v1049_v16 }
  0x1f   :  { %922 = vmatpush3.bf16.msra.mxu0 %v1050_v17  ;;  %1034 = vmatpush3.bf16.msra.mxu1 %v1050_v17 }
  0x22   :  { %375 = vmatmul.mubr.bf16.vlgmr.msra.gmra.mxu0 %v1051_v18  ;;  %439 = vmatmul.mubr.bf16.vlgmr.msra.gmra.mxu1 %v1054_v19 }
  0x23   :  { %382 = vmatprep.mubr.bf16.mxu0 %v1057_v20  ;;  %446 = vmatprep.mubr.bf16.mxu1 %v1059_v21 }
  0x2a   :  { %383 = vmatmul.mubr.bf16.gmra.mxu0 %v1061_v22  ;;  %447 = vmatmul.mubr.bf16.gmra.mxu1 %v1062_v23 }
  0x2b   :  { %390 = vmatprep.mubr.bf16.mxu0 %v1063_v24  ;;  %454 = vmatprep.mubr.bf16.mxu1 %v1065_v25 }
  0x32   :  { %391 = vmatmul.mubr.bf16.gmra.mxu0 %v1067_v26  ;;  %455 = vmatmul.mubr.bf16.gmra.mxu1 %v1068_v27 }
  0x33   :  { %398 = vmatprep.mubr.bf16.mxu0 %v1069_v28  ;;  %462 = vmatprep.mubr.bf16.mxu1 %v1071_v29 }
  0x3a   :  { %399 = vmatmul.mubr.bf16.gmra.mxu0 %v1073_v30  ;;  %463 = vmatmul.mubr.bf16.gmra.mxu1 %v1074_v31 }
  0x3b   :  { %406 = vmatprep.mubr.bf16.mxu0 %v1075_v32  ;;  %470 = vmatprep.mubr.bf16.mxu1 %v1077_v33 }
  0x42   :  { %407 = vmatmul.mubr.bf16.gmra.mxu0 %v1079_v34  ;;  %471 = vmatmul.mubr.bf16.gmra.mxu1 %v1080_v35 }
  0x43   :  { %414 = vmatprep.mubr.bf16.mxu0 %v1081_v36  ;;  %478 = vmatprep.mubr.bf16.mxu1 %v1083_v37 }
  0x4a   :  { %415 = vmatmul.mubr.bf16.gmra.mxu0 %v1085_v38  ;;  %479 = vmatmul.mubr.bf16.gmra.mxu1 %v1086_v39 }
  0x4b   :  { %422 = vmatprep.mubr.bf16.mxu0 %v1087_v40  ;;  %486 = vmatprep.mubr.bf16.mxu1 %v1089_v41 }
  0x52   :  { %423 = vmatmul.mubr.bf16.gmra.mxu0 %v1091_v42  ;;  %487 = vmatmul.mubr.bf16.gmra.mxu1 %v1092_v43 }
  0x53   :  { %430 = vmatprep.mubr.bf16.mxu0 %v1093_v44  ;;  %494 = vmatprep.mubr.bf16.mxu1 %v1095_v45 }
  0x5a   :  { %431 = vmatmul.mubr.bf16.gmra.mxu0 %v1097_v46  ;;  %495 = vmatmul.mubr.bf16.gmra.mxu1 %v1098_v47 }
  0xe2   :  { %v923_v48 = vpop.f32.mrf.mxu0  ;;  %v971_v49 = vpop.f32.mrf.mxu1 }
  0xe4   :  { %v924_v50 = vpop.f32.mrf.mxu0  ;;  %v972_v51 = vpop.f32.mrf.mxu1 }
  0xe5   :  { %v925_v53 = vadd.f32 %v924_v50, %v923_v48  ;;  %v973_v54 = vadd.f32 %v972_v51, %v971_v49 }
  0xe6   :  { %v926_v55 = vpop.f32.mrf.mxu0  ;;  %v974_v56 = vpop.f32.mrf.mxu1 }
  0xe7   :  { %v377_v57 = vadd.f32 %v925_v53, %v1266_v52  ;;  %v441_v58 = vadd.f32 %v973_v54, %v1266_v52 }
  0xe8   :  { %v927_v59 = vpop.f32.mrf.mxu0  ;;  %v975_v60 = vpop.f32.mrf.mxu1 }
  0xe9   :  { %v928_v61 = vadd.f32 %v927_v59, %v926_v55  ;;  %v976_v62 = vadd.f32 %v975_v60, %v974_v56  ;;  %v503_v3 = vmax.f32 %v377_v57, 0.0  ;;  %v519_v4 = vmax.f32 %v441_v58, 0.0 }
  0xea   :  { %v929_v63 = vpop.f32.mrf.mxu0  ;;  %v977_v0 = vpop.f32.mrf.mxu1 }
  0xeb   :  { %v380_v1 = vadd.f32 %v928_v61, %v1266_v52  ;;  %v444_v2 = vadd.f32 %v976_v62, %v1266_v52 }
  0xec   :  { %v930_v5 = vpop.f32.mrf.mxu0  ;;  %v978_v6 = vpop.f32.mrf.mxu1 }
  0xed   :  { %v504_v7 = vmax.f32 %v380_v1, 0.0  ;;  %v520_v8 = vmax.f32 %v444_v2, 0.0  ;;  %v931_v9 = vadd.f32 %v930_v5, %v929_v63  ;;  %v979_v10 = vadd.f32 %v978_v6, %v977_v0 }
  0xee   :  { %v932_v11 = vpop.f32.mrf.mxu0  ;;  %v980_v12 = vpop.f32.mrf.mxu1 }
  0xef   :  { %v815_v13 = vpack.c.bf16 %v504_v7, %v503_v3  ;;  %v855_v14 = vpack.c.bf16 %v520_v8, %v519_v4  ;;  %v385_v15 = vadd.f32 %v931_v9, %v1266_v52  ;;  %v449_v16 = vadd.f32 %v979_v10, %v1266_v52 }
  0xf0   :  { %v933_v17 = vpop.f32.mrf.mxu0  ;;  %v981_v18 = vpop.f32.mrf.mxu1 }
  0xf1   :  { %816 = vst [vmem:[%s1351_s3] sm:$0xff] %v815_v13   ;;  %899 = vst [vmem:[%s1351_s3 + $0x40] sm:$0xff] %v855_v14   ;;  %v934_v19 = vadd.f32 %v933_v17, %v932_v11  ;;  %v982_v20 = vadd.f32 %v981_v18, %v980_v12  ;;  %v505_v25 = vmax.f32 %v385_v15, 0.0  ;;  %v521_v26 = vmax.f32 %v449_v16, 0.0 }
  0xf2   :  { %v935_v21 = vpop.f32.mrf.mxu0  ;;  %v983_v22 = vpop.f32.mrf.mxu1 }
  0xf3   :  { %v388_v23 = vadd.f32 %v934_v19, %v1266_v52  ;;  %v452_v24 = vadd.f32 %v982_v20, %v1266_v52 }
  0xf4   :  { %v936_v27 = vpop.f32.mrf.mxu0  ;;  %v984_v28 = vpop.f32.mrf.mxu1 }
  0xf5   :  { %v506_v29 = vmax.f32 %v388_v23, 0.0  ;;  %v522_v30 = vmax.f32 %v452_v24, 0.0  ;;  %v937_v31 = vadd.f32 %v936_v27, %v935_v21  ;;  %v985_v32 = vadd.f32 %v984_v28, %v983_v22 }
  0xf6   :  { %v938_v33 = vpop.f32.mrf.mxu0  ;;  %v986_v34 = vpop.f32.mrf.mxu1 }
  0xf7   :  { %v820_v35 = vpack.c.bf16 %v506_v29, %v505_v25  ;;  %v860_v36 = vpack.c.bf16 %v522_v30, %v521_v26  ;;  %v393_v37 = vadd.f32 %v937_v31, %v1266_v52  ;;  %v457_v38 = vadd.f32 %v985_v32, %v1266_v52 }
  0xf8   :  { %v939_v39 = vpop.f32.mrf.mxu0  ;;  %v987_v40 = vpop.f32.mrf.mxu1 }
  0xf9   :  { %892 = vst [vmem:[%s1351_s3 + $0x8] sm:$0xff] %v820_v35   ;;  %900 = vst [vmem:[%s1351_s3 + $0x48] sm:$0xff] %v860_v36   ;;  %v940_v41 = vadd.f32 %v939_v39, %v938_v33  ;;  %v988_v42 = vadd.f32 %v987_v40, %v986_v34  ;;  %v507_v47 = vmax.f32 %v393_v37, 0.0  ;;  %v523_v48 = vmax.f32 %v457_v38, 0.0 }
  0xfa   :  { %v941_v43 = vpop.f32.mrf.mxu0  ;;  %v989_v44 = vpop.f32.mrf.mxu1 }
  0xfb   :  { %v396_v45 = vadd.f32 %v940_v41, %v1266_v52  ;;  %v460_v46 = vadd.f32 %v988_v42, %v1266_v52 }
  0xfc   :  { %v942_v49 = vpop.f32.mrf.mxu0  ;;  %v990_v50 = vpop.f32.mrf.mxu1 }
  0xfd   :  { %v508_v51 = vmax.f32 %v396_v45, 0.0  ;;  %v524_v53 = vmax.f32 %v460_v46, 0.0  ;;  %v943_v54 = vadd.f32 %v942_v49, %v941_v43  ;;  %v991_v55 = vadd.f32 %v990_v50, %v989_v44 }
  0xfe   :  { %v944_v56 = vpop.f32.mrf.mxu0  ;;  %v992_v57 = vpop.f32.mrf.mxu1 }
  0xff   :  { %v825_v58 = vpack.c.bf16 %v508_v51, %v507_v47  ;;  %v865_v59 = vpack.c.bf16 %v524_v53, %v523_v48  ;;  %v401_v60 = vadd.f32 %v943_v54, %v1266_v52  ;;  %v465_v61 = vadd.f32 %v991_v55, %v1266_v52 }
 0x100   :  { %v945_v62 = vpop.f32.mrf.mxu0  ;;  %v993_v63 = vpop.f32.mrf.mxu1 }
 0x101   :  { %893 = vst [vmem:[%s1351_s3 + $0x10] sm:$0xff] %v825_v58   ;;  %901 = vst [vmem:[%s1351_s3 + $0x50] sm:$0xff] %v865_v59   ;;  %v946_v0 = vadd.f32 %v945_v62, %v944_v56  ;;  %v994_v1 = vadd.f32 %v993_v63, %v992_v57  ;;  %v509_v6 = vmax.f32 %v401_v60, 0.0  ;;  %v525_v7 = vmax.f32 %v465_v61, 0.0 }
 0x102   :  { %v947_v2 = vpop.f32.mrf.mxu0  ;;  %v995_v3 = vpop.f32.mrf.mxu1 }
 0x103   :  { %v404_v4 = vadd.f32 %v946_v0, %v1266_v52  ;;  %v468_v5 = vadd.f32 %v994_v1, %v1266_v52 }
 0x104   :  { %v948_v8 = vpop.f32.mrf.mxu0  ;;  %v996_v9 = vpop.f32.mrf.mxu1 }
 0x105   :  { %v510_v10 = vmax.f32 %v404_v4, 0.0  ;;  %v526_v11 = vmax.f32 %v468_v5, 0.0  ;;  %v949_v12 = vadd.f32 %v948_v8, %v947_v2  ;;  %v997_v13 = vadd.f32 %v996_v9, %v995_v3 }
 0x106   :  { %v950_v14 = vpop.f32.mrf.mxu0  ;;  %v998_v15 = vpop.f32.mrf.mxu1 }
 0x107   :  { %v830_v16 = vpack.c.bf16 %v510_v10, %v509_v6  ;;  %v870_v17 = vpack.c.bf16 %v526_v11, %v525_v7  ;;  %v409_v18 = vadd.f32 %v949_v12, %v1266_v52  ;;  %v473_v19 = vadd.f32 %v997_v13, %v1266_v52 }
 0x108   :  { %v951_v20 = vpop.f32.mrf.mxu0  ;;  %v999_v21 = vpop.f32.mrf.mxu1 }
 0x109   :  { %894 = vst [vmem:[%s1351_s3 + $0x18] sm:$0xff] %v830_v16   ;;  %902 = vst [vmem:[%s1351_s3 + $0x58] sm:$0xff] %v870_v17   ;;  %v952_v22 = vadd.f32 %v951_v20, %v950_v14  ;;  %v1000_v23 = vadd.f32 %v999_v21, %v998_v15  ;;  %v511_v28 = vmax.f32 %v409_v18, 0.0  ;;  %v527_v29 = vmax.f32 %v473_v19, 0.0 }
 0x10a   :  { %v953_v24 = vpop.f32.mrf.mxu0  ;;  %v1001_v25 = vpop.f32.mrf.mxu1 }
 0x10b   :  { %v412_v26 = vadd.f32 %v952_v22, %v1266_v52  ;;  %v476_v27 = vadd.f32 %v1000_v23, %v1266_v52 }
 0x10c   :  { %v954_v30 = vpop.f32.mrf.mxu0  ;;  %v1002_v31 = vpop.f32.mrf.mxu1 }
 0x10d   :  { %v512_v32 = vmax.f32 %v412_v26, 0.0  ;;  %v528_v33 = vmax.f32 %v476_v27, 0.0  ;;  %v955_v34 = vadd.f32 %v954_v30, %v953_v24  ;;  %v1003_v35 = vadd.f32 %v1002_v31, %v1001_v25 }
 0x10e   :  { %v956_v36 = vpop.f32.mrf.mxu0  ;;  %v1004_v37 = vpop.f32.mrf.mxu1 }
 0x10f   :  { %v835_v38 = vpack.c.bf16 %v512_v32, %v511_v28  ;;  %v875_v39 = vpack.c.bf16 %v528_v33, %v527_v29  ;;  %v417_v40 = vadd.f32 %v955_v34, %v1266_v52  ;;  %v481_v41 = vadd.f32 %v1003_v35, %v1266_v52 }
 0x110   :  { %v957_v42 = vpop.f32.mrf.mxu0  ;;  %v1005_v43 = vpop.f32.mrf.mxu1 }
 0x111   :  { %895 = vst [vmem:[%s1351_s3 + $0x20] sm:$0xff] %v835_v38   ;;  %903 = vst [vmem:[%s1351_s3 + $0x60] sm:$0xff] %v875_v39   ;;  %v958_v44 = vadd.f32 %v957_v42, %v956_v36  ;;  %v1006_v45 = vadd.f32 %v1005_v43, %v1004_v37  ;;  %v513_v50 = vmax.f32 %v417_v40, 0.0  ;;  %v529_v51 = vmax.f32 %v481_v41, 0.0 }
 0x112   :  { %v959_v46 = vpop.f32.mrf.mxu0  ;;  %v1007_v47 = vpop.f32.mrf.mxu1 }
 0x113   :  { %v420_v48 = vadd.f32 %v958_v44, %v1266_v52  ;;  %v484_v49 = vadd.f32 %v1006_v45, %v1266_v52 }
 0x114   :  { %v960_v53 = vpop.f32.mrf.mxu0  ;;  %v1008_v54 = vpop.f32.mrf.mxu1 }
 0x115   :  { %v514_v55 = vmax.f32 %v420_v48, 0.0  ;;  %v530_v56 = vmax.f32 %v484_v49, 0.0  ;;  %v961_v57 = vadd.f32 %v960_v53, %v959_v46  ;;  %v1009_v58 = vadd.f32 %v1008_v54, %v1007_v47 }
 0x116   :  { %v962_v59 = vpop.f32.mrf.mxu0  ;;  %v1010_v60 = vpop.f32.mrf.mxu1 }
 0x117   :  { %v840_v61 = vpack.c.bf16 %v514_v55, %v513_v50  ;;  %v880_v62 = vpack.c.bf16 %v530_v56, %v529_v51  ;;  %v425_v63 = vadd.f32 %v961_v57, %v1266_v52  ;;  %v489_v0 = vadd.f32 %v1009_v58, %v1266_v52 }
 0x118   :  { %v963_v1 = vpop.f32.mrf.mxu0  ;;  %v1011_v2 = vpop.f32.mrf.mxu1 }
 0x119   :  { %896 = vst [vmem:[%s1351_s3 + $0x28] sm:$0xff] %v840_v61   ;;  %904 = vst [vmem:[%s1351_s3 + $0x68] sm:$0xff] %v880_v62   ;;  %v964_v3 = vadd.f32 %v963_v1, %v962_v59  ;;  %v1012_v4 = vadd.f32 %v1011_v2, %v1010_v60  ;;  %v515_v9 = vmax.f32 %v425_v63, 0.0  ;;  %v531_v10 = vmax.f32 %v489_v0, 0.0 }
 0x11a   :  { %v965_v5 = vpop.f32.mrf.mxu0  ;;  %v1013_v6 = vpop.f32.mrf.mxu1 }
 0x11b   :  { %v428_v7 = vadd.f32 %v964_v3, %v1266_v52  ;;  %v492_v8 = vadd.f32 %v1012_v4, %v1266_v52 }
 0x11c   :  { %v966_v11 = vpop.f32.mrf.mxu0  ;;  %v1014_v12 = vpop.f32.mrf.mxu1 }
 0x11d   :  { %v516_v13 = vmax.f32 %v428_v7, 0.0  ;;  %v532_v14 = vmax.f32 %v492_v8, 0.0  ;;  %v967_v15 = vadd.f32 %v966_v11, %v965_v5  ;;  %v1015_v16 = vadd.f32 %v1014_v12, %v1013_v6 }
 0x11e   :  { %v968_v17 = vpop.f32.mrf.mxu0  ;;  %v1016_v18 = vpop.f32.mrf.mxu1 }
 0x11f   :  { %v845_v19 = vpack.c.bf16 %v516_v13, %v515_v9  ;;  %v885_v20 = vpack.c.bf16 %v532_v14, %v531_v10  ;;  %v433_v23 = vadd.f32 %v967_v15, %v1266_v52  ;;  %v497_v24 = vadd.f32 %v1015_v16, %v1266_v52 }
 0x120   :  { %v969_v21 = vpop.f32.mrf.mxu0  ;;  %v1017_v22 = vpop.f32.mrf.mxu1 }
 0x121   :  { %897 = vst [vmem:[%s1351_s3 + $0x30] sm:$0xff] %v845_v19   ;;  %905 = vst [vmem:[%s1351_s3 + $0x70] sm:$0xff] %v885_v20   ;;  %v970_v25 = vadd.f32 %v969_v21, %v968_v17  ;;  %v1018_v26 = vadd.f32 %v1017_v22, %v1016_v18  ;;  %v517_v29 = vmax.f32 %v433_v23, 0.0  ;;  %v533_v30 = vmax.f32 %v497_v24, 0.0 }
 0x123   :  { %v436_v27 = vadd.f32 %v970_v25, %v1266_v52  ;;  %v500_v28 = vadd.f32 %v1018_v26, %v1266_v52 }
 0x125   :  { %v518_v31 = vmax.f32 %v436_v27, 0.0  ;;  %v534_v32 = vmax.f32 %v500_v28, 0.0 }
 0x127   :  { %v850_v33 = vpack.c.bf16 %v518_v31, %v517_v29  ;;  %v890_v34 = vpack.c.bf16 %v534_v32, %v533_v30 }
 0x129   :  { %898 = vst [vmem:[%s1351_s3 + $0x38] sm:$0xff] %v850_v33   ;;  %906 = vst [vmem:[%s1351_s3 + $0x78] sm:$0xff] %v890_v34  }

// kernel: mlp_dueling_qnet_forward.5
= control target key start
LH: loop header
LB: loop body
LE: loop exit
PB: predicated region body
PF: predicated region fallthrough
CT: control target
= control target key end

     0   :  { %s860_s1 = inlined_call_operand.vmem [shape: bf16[512,128], index: 1, kind: input, shape index: {}]   ;;  %s861_s0 = inlined_call_operand.vmem [shape: bf16[48,512], index: 0, kind: input, shape index: {}]   ;;  %s862_s2 = inlined_call_operand.vmem [shape: f32[1,128], index: 2, kind: input, shape index: {}]   ;;  %s863_s3 = inlined_call_operand.vmem [shape: bf16[48,128], index: 3, kind: output, shape index: {}]  }
   0x1   :  { %v646_v0 = vld [vmem:[%s860_s1 + $0x78] sm:$0xff]   ;;  %v650_v4 = vld [vmem:[%s860_s1 + $0x70] sm:$0xff]   ;;  %v654_v8 = vld [vmem:[%s860_s1 + $0x68] sm:$0xff]  }
   0x2   :  { %v647_v1 = vld [vmem:[%s860_s1 + $0xf8] sm:$0xff]   ;;  %578 = vmatprep.subr.bf16.mxu0 %v646_v0  ;;  %v651_v5 = vld [vmem:[%s860_s1 + $0xf0] sm:$0xff]   ;;  %v655_v9 = vld [vmem:[%s860_s1 + $0xe8] sm:$0xff]  }
   0x3   :  { %v648_v2 = vld [vmem:[%s860_s1 + $0x38] sm:$0xff]   ;;  %612 = vmatprep.subr.bf16.mxu1 %v647_v1  ;;  %v652_v6 = vld [vmem:[%s860_s1 + $0x30] sm:$0xff]   ;;  %v656_v10 = vld [vmem:[%s860_s1 + $0x28] sm:$0xff]  }
   0x4   :  { %v649_v3 = vld [vmem:[%s860_s1 + $0xb8] sm:$0xff]   ;;  %579 = vmatpush3.bf16.msra.mxu0 %v648_v2  ;;  %v653_v7 = vld [vmem:[%s860_s1 + $0xb0] sm:$0xff]   ;;  %v657_v11 = vld [vmem:[%s860_s1 + $0xa8] sm:$0xff]  }
   0x5   :  { %613 = vmatpush3.bf16.msra.mxu1 %v649_v3  ;;  %580 = vmatprep.subr.bf16.mxu0 %v650_v4  ;;  %v658_v12 = vld [vmem:[%s860_s1 + $0x60] sm:$0xff]   ;;  %v662_v16 = vld [vmem:[%s860_s1 + $0x58] sm:$0xff]   ;;  %v666_v20 = vld [vmem:[%s860_s1 + $0x50] sm:$0xff]  }
   0x6   :  { %614 = vmatprep.subr.bf16.mxu1 %v651_v5  ;;  %v659_v13 = vld [vmem:[%s860_s1 + $0xe0] sm:$0xff]   ;;  %v663_v17 = vld [vmem:[%s860_s1 + $0xd8] sm:$0xff]   ;;  %v667_v21 = vld [vmem:[%s860_s1 + $0xd0] sm:$0xff]  }
   0x7   :  { %v660_v14 = vld [vmem:[%s860_s1 + $0x20] sm:$0xff]   ;;  %v664_v18 = vld [vmem:[%s860_s1 + $0x18] sm:$0xff]   ;;  %v668_v22 = vld [vmem:[%s860_s1 + $0x10] sm:$0xff]  }
   0x8   :  { %581 = vmatpush3.bf16.msra.mxu0 %v652_v6  ;;  %v661_v15 = vld [vmem:[%s860_s1 + $0xa0] sm:$0xff]   ;;  %v665_v19 = vld [vmem:[%s860_s1 + $0x98] sm:$0xff]   ;;  %v669_v23 = vld [vmem:[%s860_s1 + $0x90] sm:$0xff]  }
   0x9   :  { %615 = vmatpush3.bf16.msra.mxu1 %v653_v7  ;;  %582 = vmatprep.subr.bf16.mxu0 %v654_v8  ;;  %v670_v24 = vld [vmem:[%s860_s1 + $0x48] sm:$0xff]   ;;  %v674_v28 = vld [vmem:[%s860_s1 + $0x40] sm:$0xff]  }
   0xa   :  { %616 = vmatprep.subr.bf16.mxu1 %v655_v9  ;;  %v671_v25 = vld [vmem:[%s860_s1 + $0xc8] sm:$0xff]   ;;  %v675_v29 = vld [vmem:[%s860_s1 + $0xc0] sm:$0xff]  }
   0xb   :  { %v672_v26 = vld [vmem:[%s860_s1 + $0x8] sm:$0xff]   ;;  %v676_v30 = vld [vmem:[%s860_s1] sm:$0xff]  }
   0xc   :  { %583 = vmatpush3.bf16.msra.mxu0 %v656_v10  ;;  %v673_v27 = vld [vmem:[%s860_s1 + $0x88] sm:$0xff]   ;;  %v677_v31 = vld [vmem:[%s860_s1 + $0x80] sm:$0xff]  }
   0xd   :  { %617 = vmatpush3.bf16.msra.mxu1 %v657_v11  ;;  %584 = vmatprep.subr.bf16.mxu0 %v658_v12  ;;  %v678_v32 = vld [vmem:[%s861_s0] ss:$16 sps:$4 sm:$0xff]   ;;  %v680_v33 = vld [vmem:[%s861_s0 + $0x4] ss:$16 sps:$4 sm:$0xff]   ;;  %v681_v34 = vld [vmem:[%s861_s0 + $0x8] ss:$16 sps:$4 sm:$0xff]  }
   0xe   :  { %618 = vmatprep.subr.bf16.mxu1 %v659_v13  ;;  %v683_v35 = vld [vmem:[%s861_s0 + $0xc] ss:$16 sps:$4 sm:$0xff]   ;;  %382 = vmatprep.mubr.bf16.mxu0 %v680_v33  ;;  %v684_v36 = vld [vmem:[%s861_s0 + $0x24] ss:$16 sps:$4 sm:$0xff]   ;;  %v688_v38 = vld [vmem:[%s861_s0 + $0x20] ss:$16 sps:$4 sm:$0xff]  }
   0xf   :  { %439 = vmatprep.mubr.bf16.mxu1 %v683_v35  ;;  %v686_v37 = vld [vmem:[%s861_s0 + $0x2c] ss:$16 sps:$4 sm:$0xff]   ;;  %v689_v39 = vld [vmem:[%s861_s0 + $0x28] ss:$16 sps:$4 sm:$0xff]   ;;  %v690_v40 = vld [vmem:[%s861_s0 + $0x44] ss:$16 sps:$4 sm:$0xff]  }
  0x10   :  { %585 = vmatpush3.bf16.msra.mxu0 %v660_v14  ;;  %v692_v41 = vld [vmem:[%s861_s0 + $0x4c] ss:$16 sps:$4 sm:$0xff]   ;;  %v694_v42 = vld [vmem:[%s861_s0 + $0x40] ss:$16 sps:$4 sm:$0xff]   ;;  %v695_v43 = vld [vmem:[%s861_s0 + $0x48] ss:$16 sps:$4 sm:$0xff]  }
  0x11   :  { %619 = vmatpush3.bf16.msra.mxu1 %v661_v15  ;;  %586 = vmatprep.subr.bf16.mxu0 %v662_v16  ;;  %v504_v46 = vld [vmem:[%s862_s2] ss:$0 sm:$0xff] }
  0x12   :  { %620 = vmatprep.subr.bf16.mxu1 %v663_v17 }
  0x14   :  { %587 = vmatpush3.bf16.msra.mxu0 %v664_v18 }
  0x15   :  { %621 = vmatpush3.bf16.msra.mxu1 %v665_v19  ;;  %588 = vmatprep.subr.bf16.mxu0 %v666_v20 }
  0x16   :  { %622 = vmatprep.subr.bf16.mxu1 %v667_v21 }
  0x18   :  { %589 = vmatpush3.bf16.msra.mxu0 %v668_v22 }
  0x19   :  { %623 = vmatpush3.bf16.msra.mxu1 %v669_v23  ;;  %590 = vmatprep.subr.bf16.mxu0 %v670_v24 }
  0x1a   :  { %624 = vmatprep.subr.bf16.mxu1 %v671_v25 }
  0x1c   :  { %591 = vmatpush3.bf16.msra.mxu0 %v672_v26 }
  0x1d   :  { %625 = vmatpush3.bf16.msra.mxu1 %v673_v27  ;;  %592 = vmatprep.subr.bf16.mxu0 %v674_v28 }
  0x1e   :  { %626 = vmatprep.subr.bf16.mxu1 %v675_v29 }
  0x20   :  { %593 = vmatpush3.bf16.msra.mxu0 %v676_v30 }
  0x21   :  { %627 = vmatpush3.bf16.msra.mxu1 %v677_v31 }
  0x23   :  { %383 = vmatmul.mubr.bf16.vlgmr.msra.gmra.mxu0 %v678_v32 }
  0x24   :  { %440 = vmatmul.mubr.bf16.vlgmr.msra.gmra.mxu1 %v681_v34  ;;  %390 = vmatprep.mubr.bf16.mxu0 %v684_v36 }
  0x25   :  { %447 = vmatprep.mubr.bf16.mxu1 %v686_v37 }
  0x2b   :  { %391 = vmatmul.mubr.bf16.gmra.mxu0 %v688_v38 }
  0x2c   :  { %448 = vmatmul.mubr.bf16.gmra.mxu1 %v689_v39  ;;  %398 = vmatprep.mubr.bf16.mxu0 %v690_v40 }
  0x2d   :  { %455 = vmatprep.mubr.bf16.mxu1 %v692_v41 }
  0x33   :  { %399 = vmatmul.mubr.bf16.gmra.mxu0 %v694_v42 }
  0x34   :  { %456 = vmatmul.mubr.bf16.gmra.mxu1 %v695_v43 }
  0xe3   :  { %v594_v44 = vpop.f32.mrf.mxu0 }
  0xe4   :  { %v628_v45 = vpop.f32.mrf.mxu1 }
  0xe5   :  { %v595_v47 = vpop.f32.mrf.mxu0 }
  0xe6   :  { %v596_v48 = vadd.f32 %v595_v47, %v594_v44  ;;  %v629_v49 = vpop.f32.mrf.mxu1 }
  0xe7   :  { %v597_v50 = vpop.f32.mrf.mxu0  ;;  %v630_v54 = vadd.f32 %v629_v49, %v628_v45 }
  0xe8   :  { %v385_v51 = vadd.f32 %v596_v48, %v504_v46  ;;  %v631_v52 = vpop.f32.mrf.mxu1 }
  0xe9   :  { %v598_v53 = vpop.f32.mrf.mxu0 }
  0xea   :  { %v599_v55 = vadd.f32 %v598_v53, %v597_v50  ;;  %v632_v56 = vpop.f32.mrf.mxu1  ;;  %v442_v58 = vadd.f32 %v630_v54, %v385_v51 }
  0xeb   :  { %v600_v57 = vpop.f32.mrf.mxu0  ;;  %v633_v60 = vadd.f32 %v632_v56, %v631_v52 }
  0xec   :  { %v388_v59 = vadd.f32 %v599_v55, %v504_v46  ;;  %v634_v61 = vpop.f32.mrf.mxu1  ;;  %v464_v3 = vmax.f32 %v442_v58, 0.0 }
  0xed   :  { %v601_v62 = vpop.f32.mrf.mxu0 }
  0xee   :  { %v445_v63 = vadd.f32 %v633_v60, %v388_v59  ;;  %v602_v0 = vadd.f32 %v601_v62, %v600_v57  ;;  %v635_v1 = vpop.f32.mrf.mxu1 }
  0xef   :  { %v603_v2 = vpop.f32.mrf.mxu0  ;;  %v636_v9 = vadd.f32 %v635_v1, %v634_v61 }
  0xf0   :  { %v465_v4 = vmax.f32 %v445_v63, 0.0  ;;  %v393_v5 = vadd.f32 %v602_v0, %v504_v46  ;;  %v637_v6 = vpop.f32.mrf.mxu1 }
  0xf1   :  { %v604_v7 = vpop.f32.mrf.mxu0 }
  0xf2   :  { %v564_v8 = vpack.c.bf16 %v465_v4, %v464_v3  ;;  %v605_v10 = vadd.f32 %v604_v7, %v603_v2  ;;  %v638_v11 = vpop.f32.mrf.mxu1  ;;  %v450_v13 = vadd.f32 %v636_v9, %v393_v5 }
  0xf3   :  { %v606_v12 = vpop.f32.mrf.mxu0  ;;  %v639_v15 = vadd.f32 %v638_v11, %v637_v6 }
  0xf4   :  { %565 = vst [vmem:[%s863_s3] sm:$0xff] %v564_v8   ;;  %v396_v14 = vadd.f32 %v605_v10, %v504_v46  ;;  %v640_v16 = vpop.f32.mrf.mxu1  ;;  %v466_v22 = vmax.f32 %v450_v13, 0.0 }
  0xf5   :  { %v607_v17 = vpop.f32.mrf.mxu0 }
  0xf6   :  { %v453_v18 = vadd.f32 %v639_v15, %v396_v14  ;;  %v608_v19 = vadd.f32 %v607_v17, %v606_v12  ;;  %v641_v20 = vpop.f32.mrf.mxu1 }
  0xf7   :  { %v609_v21 = vpop.f32.mrf.mxu0  ;;  %v642_v28 = vadd.f32 %v641_v20, %v640_v16 }
  0xf8   :  { %v467_v23 = vmax.f32 %v453_v18, 0.0  ;;  %v401_v24 = vadd.f32 %v608_v19, %v504_v46  ;;  %v643_v25 = vpop.f32.mrf.mxu1 }
  0xf9   :  { %v610_v26 = vpop.f32.mrf.mxu0 }
  0xfa   :  { %v569_v27 = vpack.c.bf16 %v467_v23, %v466_v22  ;;  %v611_v29 = vadd.f32 %v610_v26, %v609_v21  ;;  %v644_v30 = vpop.f32.mrf.mxu1  ;;  %v458_v31 = vadd.f32 %v642_v28, %v401_v24 }
  0xfb   :  { %v645_v33 = vadd.f32 %v644_v30, %v643_v25 }
  0xfc   :  { %576 = vst [vmem:[%s863_s3 + $0x8] sm:$0xff] %v569_v27   ;;  %v404_v32 = vadd.f32 %v611_v29, %v504_v46  ;;  %v468_v35 = vmax.f32 %v458_v31, 0.0 }
  0xfe   :  { %v461_v34 = vadd.f32 %v645_v33, %v404_v32 }
 0x100   :  { %v469_v36 = vmax.f32 %v461_v34, 0.0 }
 0x102   :  { %v574_v37 = vpack.c.bf16 %v469_v36, %v468_v35 }
 0x104   :  { %577 = vst [vmem:[%s863_s3 + $0x10] sm:$0xff] %v574_v37  }

// kernel: mlp_dueling_qnet_forward.6
= control target key start
LH: loop header
LB: loop body
LE: loop exit
PB: predicated region body
PF: predicated region fallthrough
CT: control target
= control target key end

     0   :  { %v642_v33 = vmov 0.0   ;;  %vm643_vm0 = vmmov 0   ;;  %vm341_vm1 = vcmask 523264   ;;  %s793_s1 = inlined_call_operand.vmem [shape: bf16[576,128], index: 1, kind: input, shape index: {}]   ;;  %s794_s0 = inlined_call_operand.vmem [shape: bf16[16,576], index: 0, kind: input, shape index: {}]   ;;  %s795_s2 = inlined_call_operand.vmem [shape: f32[1,128], index: 2, kind: input, shape index: {}]   ;;  %s796_s3 = inlined_call_operand.vmem [shape: bf16[16,128], index: 3, kind: output, shape index: {}]  }
   0x1   :  { %v599_v0 = vld [vmem:[%s793_s1 + $0x78] sm:$0xff]   ;;  %v603_v4 = vld [vmem:[%s793_s1 + $0x70] sm:$0xff]   ;;  %v607_v8 = vld [vmem:[%s793_s1 + $0x68] sm:$0xff]  }
   0x2   :  { %v600_v1 = vld [vmem:[%s793_s1 + $0x38] sm:$0xff]   ;;  %536 = vmatprep.subr.bf16.mxu0 %v599_v0  ;;  %v604_v5 = vld [vmem:[%s793_s1 + $0x30] sm:$0xff]   ;;  %v608_v9 = vld [vmem:[%s793_s1 + $0x28] sm:$0xff]  }
   0x3   :  { %v601_v2 = vld [vmem:[%s793_s1 + $0xf8] sm:$0xff]   ;;  %537 = vmatpush3.bf16.msra.mxu0 %v600_v1  ;;  %v605_v6 = vld [vmem:[%s793_s1 + $0xf0] sm:$0xff]   ;;  %v609_v10 = vld [vmem:[%s793_s1 + $0xe8] sm:$0xff]  }
   0x4   :  { %v602_v3 = vld [vmem:[%s793_s1 + $0xb8] sm:$0xff]   ;;  %558 = vmatprep.subr.bf16.mxu1 %v601_v2  ;;  %538 = vmatprep.subr.bf16.mxu0 %v603_v4  ;;  %v606_v7 = vld [vmem:[%s793_s1 + $0xb0] sm:$0xff]   ;;  %v610_v11 = vld [vmem:[%s793_s1 + $0xa8] sm:$0xff]  }
   0x5   :  { %559 = vmatpush3.bf16.msra.mxu1 %v602_v3  ;;  %v611_v12 = vld [vmem:[%s793_s1 + $0x60] sm:$0xff]   ;;  %v615_v16 = vld [vmem:[%s793_s1 + $0x58] sm:$0xff]   ;;  %v619_v20 = vld [vmem:[%s793_s1 + $0x50] sm:$0xff]  }
   0x6   :  { %560 = vmatprep.subr.bf16.mxu1 %v605_v6  ;;  %v612_v13 = vld [vmem:[%s793_s1 + $0x20] sm:$0xff]   ;;  %v616_v17 = vld [vmem:[%s793_s1 + $0x18] sm:$0xff]   ;;  %v620_v21 = vld [vmem:[%s793_s1 + $0x10] sm:$0xff]  }
   0x7   :  { %539 = vmatpush3.bf16.msra.mxu0 %v604_v5  ;;  %v613_v14 = vld [vmem:[%s793_s1 + $0xe0] sm:$0xff]   ;;  %v617_v18 = vld [vmem:[%s793_s1 + $0xd8] sm:$0xff]   ;;  %v621_v22 = vld [vmem:[%s793_s1 + $0xd0] sm:$0xff]  }
   0x8   :  { %540 = vmatprep.subr.bf16.mxu0 %v607_v8  ;;  %v614_v15 = vld [vmem:[%s793_s1 + $0xa0] sm:$0xff]   ;;  %v618_v19 = vld [vmem:[%s793_s1 + $0x98] sm:$0xff]   ;;  %v622_v23 = vld [vmem:[%s793_s1 + $0x90] sm:$0xff]  }
   0x9   :  { %561 = vmatpush3.bf16.msra.mxu1 %v606_v7  ;;  %v623_v24 = vld [vmem:[%s793_s1 + $0x48] sm:$0xff]   ;;  %v627_v28 = vld [vmem:[%s793_s1 + $0x40] sm:$0xff]   ;;  %v637_v37 = vld [vmem:[%s793_s1 + $0x118] sm:$0xff]  }
   0xa   :  { %562 = vmatprep.subr.bf16.mxu1 %v609_v10  ;;  %v624_v25 = vld [vmem:[%s793_s1 + $0x8] sm:$0xff]   ;;  %v628_v29 = vld [vmem:[%s793_s1] sm:$0xff]   ;;  %v638_v38 = vld [vmem:[%s793_s1 + $0x110] sm:$0xff]  }
   0xb   :  { %541 = vmatpush3.bf16.msra.mxu0 %v608_v9  ;;  %v625_v26 = vld [vmem:[%s793_s1 + $0xc8] sm:$0xff]   ;;  %v629_v30 = vld [vmem:[%s793_s1 + $0xc0] sm:$0xff]  }
   0xc   :  { %542 = vmatprep.subr.bf16.mxu0 %v611_v12  ;;  %v626_v27 = vld [vmem:[%s793_s1 + $0x88] sm:$0xff]   ;;  %v630_v31 = vld [vmem:[%s794_s0] ss:$20 sps:$4 sm:$0xff]   ;;  %v632_v32 = vld [vmem:[%s794_s0 + $0x4] ss:$20 sps:$4 sm:$0xff]  }
   0xd   :  { %563 = vmatpush3.bf16.msra.mxu1 %v610_v11  ;;  %v633_v34 = vld [vmem:[%s793_s1 + $0x80] sm:$0xff]   ;;  %377 = vmatprep.mubr.bf16.mxu0 %v632_v32  ;;  %v634_v35 = vld [vmem:[%s794_s0 + $0x8] ss:$20 sps:$4 sm:$0xff]  }
   0xe   :  { %564 = vmatprep.subr.bf16.mxu1 %v613_v14  ;;  %v636_v36 = vld [vmem:[%s794_s0 + $0xc] ss:$20 sps:$4 sm:$0xff]   ;;  %v641_v41 = vld [vmem:[%s794_s0 + $0x10] ss:$20 sps:$4 sm:$0xff]  }
   0xf   :  { %543 = vmatpush3.bf16.msra.mxu0 %v612_v13  ;;  %418 = vmatprep.mubr.bf16.mxu1 %v636_v36  ;;  %v639_v39 = vld [vmem:[%s793_s1 + $0x108] sm:$0xff]   ;;  %v640_v40 = vld [vmem:[%s793_s1 + $0x100] sm:$0xff]  }
  0x10   :  { %544 = vmatprep.subr.bf16.mxu0 %v615_v16  ;;  %v484_v50 = vld [vmem:[%s795_s2] ss:$0 sm:$0xff] }
  0x11   :  { %565 = vmatpush3.bf16.msra.mxu1 %v614_v15 }
  0x12   :  { %566 = vmatprep.subr.bf16.mxu1 %v617_v18 }
  0x13   :  { %545 = vmatpush3.bf16.msra.mxu0 %v616_v17 }
  0x14   :  { %546 = vmatprep.subr.bf16.mxu0 %v619_v20 }
  0x15   :  { %567 = vmatpush3.bf16.msra.mxu1 %v618_v19 }
  0x16   :  { %568 = vmatprep.subr.bf16.mxu1 %v621_v22 }
  0x17   :  { %547 = vmatpush3.bf16.msra.mxu0 %v620_v21 }
  0x18   :  { %548 = vmatprep.subr.bf16.mxu0 %v623_v24 }
  0x19   :  { %569 = vmatpush3.bf16.msra.mxu1 %v622_v23 }
  0x1a   :  { %570 = vmatprep.subr.bf16.mxu1 %v625_v26 }
  0x1b   :  { %549 = vmatpush3.bf16.msra.mxu0 %v624_v25 }
  0x1c   :  { %550 = vmatprep.subr.bf16.mxu0 %v627_v28 }
  0x1d   :  { %571 = vmatpush3.bf16.msra.mxu1 %v626_v27 }
  0x1e   :  { %572 = vmatprep.subr.bf16.mxu1 %v629_v30 }
  0x1f   :  { %551 = vmatpush3.bf16.msra.mxu0 %v628_v29 }
  0x20   :  { %585 = vmatprep.subr.bf16.mxu0 %v642_v33 }
  0x21   :  { %573 = vmatpush3.bf16.msra.mxu1 %v633_v34 }
  0x22   :  { %378 = vmatmul.mubr.bf16.vlgmr.msra.gmra.mxu0 %v630_v31 }
  0x23   :  { %593 = vmatprep.mubr.msk.bf16.mxu0 %vm643_vm0, %v642_v33  ;;  %586 = vmatpush3.bf16.msra.mxu0 %v637_v37 }
  0x24   :  { %419 = vmatmul.mubr.bf16.vlgmr.msra.gmra.mxu1 %v634_v35  ;;  %587 = vmatprep.subr.bf16.mxu0 %v642_v33 }
  0x27   :  { %588 = vmatpush3.bf16.msra.mxu0 %v638_v38 }
  0x28   :  { %589 = vmatprep.subr.bf16.mxu0 %v642_v33 }
  0x2b   :  { %590 = vmatpush3.bf16.msra.mxu0 %v639_v39 }
  0x2c   :  { %591 = vmatprep.subr.bf16.mxu0 %v642_v33 }
  0x2f   :  { %592 = vmatpush3.bf16.msra.mxu0 %v640_v40 }
  0x32   :  { %594 = vmatmul.mubr.msk.bf16.vlgmr.msra.gmra.mxu0 %vm341_vm1, %v641_v41 }
  0xe2   :  { %v552_v42 = vpop.f32.mrf.mxu0 }
  0xe4   :  { %v553_v43 = vpop.f32.mrf.mxu0  ;;  %v574_v44 = vpop.f32.mrf.mxu1 }
  0xe5   :  { %v554_v49 = vadd.f32 %v553_v43, %v552_v42 }
  0xe6   :  { %v555_v45 = vpop.f32.mrf.mxu0  ;;  %v575_v46 = vpop.f32.mrf.mxu1 }
  0xe7   :  { %v380_v53 = vadd.f32 %v554_v49, %v484_v50  ;;  %v576_v54 = vadd.f32 %v575_v46, %v574_v44 }
  0xe8   :  { %v556_v47 = vpop.f32.mrf.mxu0  ;;  %v577_v48 = vpop.f32.mrf.mxu1 }
  0xe9   :  { %v557_v51 = vadd.f32 %v556_v47, %v555_v45  ;;  %v421_v58 = vadd.f32 %v576_v54, %v380_v53 }
  0xea   :  { %v578_v52 = vpop.f32.mrf.mxu1 }
  0xeb   :  { %v383_v55 = vadd.f32 %v557_v51, %v484_v50  ;;  %v579_v56 = vadd.f32 %v578_v52, %v577_v48 }
  0xed   :  { %v424_v61 = vadd.f32 %v579_v56, %v383_v55 }
  0xf2   :  { %v461_v57 = vpop.f32.mrf.mxu0 }
  0xf3   :  { %v462_v60 = vadd.f32 %v461_v57, %v421_v58 }
  0xf4   :  { %v595_v59 = vpop.f32.mrf.mxu0 }
  0xf5   :  { %v468_v1 = vmax.f32 %v462_v60, 0.0 }
  0xf6   :  { %v464_v62 = vpop.f32.mrf.mxu0 }
  0xf7   :  { %v465_v63 = vadd.f32 %v464_v62, %v424_v61 }
  0xf8   :  { %v596_v0 = vpop.f32.mrf.mxu0 }
  0xf9   :  { %v469_v2 = vmax.f32 %v465_v63, 0.0 }
  0xfb   :  { %v534_v3 = vpack.c.bf16 %v469_v2, %v468_v1 }
  0xfd   :  { %535 = vst [vmem:[%s796_s3] sm:$0xff] %v534_v3  }

// kernel: mlp_dueling_qnet_forward.7
= control target key start
LH: loop header
LB: loop body
LE: loop exit
PB: predicated region body
PF: predicated region fallthrough
CT: control target
= control target key end

     0   :  { %v1890_v1 = vmov 0   ;;  %vm160_vm0 = vcmask 523264   ;;  %s2479_s1 = inlined_call_operand.vmem [shape: bf16[64,512], index: 1, kind: input, shape index: {}]   ;;  %s2480_s0 = inlined_call_operand.vmem [shape: bf16[16,64], index: 0, kind: input, shape index: {}]   ;;  %s2481_s3 = inlined_call_operand.vmem [shape: bf16[512,512], index: 3, kind: input, shape index: {}]   ;;  %s2482_s2 = inlined_call_operand.vmem [shape: f32[1,512], index: 2, kind: input, shape index: {}]   ;;  %s2483_s7 = inlined_call_operand.vmem [shape: bf16[256,128], index: 7, kind: input, shape index: {}]   ;;  %s2484_s6 = inlined_call_operand.<no memory space> [shape: f32[1,1], index: 6, kind: input, shape index: {}]   ;;  %s2485_s4 = inlined_call_operand.vmem [shape: f32[1,512], index: 4, kind: input, shape index: {}]   ;;  %s2486_s5 = inlined_call_operand.vmem [shape: f32[1,256], index: 5, kind: input, shape index: {}]   ;;  %s2487_s8 = inlined_call_operand.vmem [shape: f32[1,128], index: 8, kind: input, shape index: {}]   ;;  %s2488_s9 = inlined_call_operand.vmem [shape: f32[16,128], index: 9, kind: output, shape index: {}]  }
   0x1   :  { %v1657_v0 = vld [vmem:[%s2479_s1 + $0x64] ss:$16 sps:$4 sm:$0xff]   ;;  %196 = vmatprep.mubr.bf16.mxu1 %v1890_v1  ;;  %1655 = vset.pattern.permute.xlu0 %v1890_v1  ;;  %v1659_v2 = vld [vmem:[%s2479_s1 + $0x60] ss:$16 sps:$4 sm:$0xff]   ;;  %v1672_v9 = vld [vmem:[%s2479_s1 + $0x6c] ss:$16 sps:$4 sm:$0xff]  }
   0x2   :  { %1656 = vset.pattern.permute.xlu1 %v1890_v1  ;;  %172 = vmatprep.subr.bf16.mxu1 %v1657_v0  ;;  %v1660_v3 = vld [vmem:[%s2479_s1 + $0x44] ss:$16 sps:$4 sm:$0xff]   ;;  %v1662_v4 = vld [vmem:[%s2479_s1 + $0x40] ss:$16 sps:$4 sm:$0xff]   ;;  %v1670_v14 = vld [vmem:[%s2479_s1 + $0x68] ss:$16 sps:$4 sm:$0xff]  }
   0x3   :  { %173 = vmatpush1.bf16.msra.mxu1 %v1659_v2  ;;  %v1663_v5 = vld [vmem:[%s2479_s1 + $0x24] ss:$16 sps:$4 sm:$0xff]   ;;  %v1665_v6 = vld [vmem:[%s2479_s1 + $0x20] ss:$16 sps:$4 sm:$0xff]   ;;  %v1675_v15 = vld [vmem:[%s2479_s1 + $0x4c] ss:$16 sps:$4 sm:$0xff]  }
   0x4   :  { %174 = vmatprep.subr.bf16.mxu1 %v1660_v3  ;;  %v1666_v7 = vld [vmem:[%s2479_s1 + $0x4] ss:$16 sps:$4 sm:$0xff]   ;;  %v1668_v8 = vld [vmem:[%s2479_s1] ss:$16 sps:$4 sm:$0xff]   ;;  %v1673_v18 = vld [vmem:[%s2479_s1 + $0x48] ss:$16 sps:$4 sm:$0xff]  }
   0x5   :  { %v1682_v10 = vld [vmem:[%s2481_s3 + $0xe4] ss:$16 sps:$4 sm:$0xff]   ;;  %v1684_v11 = vld [vmem:[%s2481_s3 + $0xe0] ss:$16 sps:$4 sm:$0xff]   ;;  %v1678_v19 = vld [vmem:[%s2479_s1 + $0x2c] ss:$16 sps:$4 sm:$0xff]  }
   0x6   :  { %v1685_v12 = vld [vmem:[%s2481_s3 + $0xc4] ss:$16 sps:$4 sm:$0xff]   ;;  %1052 = vmatprep.subr.bf16.mxu0 %v1682_v10  ;;  %v1687_v16 = vld [vmem:[%s2481_s3 + $0xc0] ss:$16 sps:$4 sm:$0xff]   ;;  %v1676_v22 = vld [vmem:[%s2479_s1 + $0x28] ss:$16 sps:$4 sm:$0xff]  }
   0x7   :  { %175 = vmatpush1.bf16.msra.mxu1 %v1662_v4  ;;  %v1669_v13 = vld [vmem:[%s2480_s0] sm:$0xff]   ;;  %1053 = vmatpush1.bf16.msra.mxu0 %v1684_v11  ;;  %v1681_v23 = vld [vmem:[%s2479_s1 + $0xc] ss:$16 sps:$4 sm:$0xff]   ;;  %v1679_v26 = vld [vmem:[%s2479_s1 + $0x8] ss:$16 sps:$4 sm:$0xff]  }
   0x8   :  { %176 = vmatprep.subr.bf16.mxu1 %v1663_v5  ;;  %1054 = vmatprep.subr.bf16.mxu0 %v1685_v12  ;;  %v1688_v17 = vld [vmem:[%s2481_s3 + $0xa4] ss:$16 sps:$4 sm:$0xff]   ;;  %v1690_v20 = vld [vmem:[%s2481_s3 + $0xa0] ss:$16 sps:$4 sm:$0xff]   ;;  %v1771_v11 = vld [vmem:[%s2481_s3 + $0xec] ss:$16 sps:$4 sm:$0xff]  }
   0x9   :  { %v1691_v21 = vld [vmem:[%s2481_s3 + $0x84] ss:$16 sps:$4 sm:$0xff]   ;;  %v1693_v24 = vld [vmem:[%s2481_s3 + $0x80] ss:$16 sps:$4 sm:$0xff]  }
   0xa   :  { %v1694_v25 = vld [vmem:[%s2481_s3 + $0x64] ss:$16 sps:$4 sm:$0xff]   ;;  %v1699_v28 = vld [vmem:[%s2481_s3 + $0x60] ss:$16 sps:$4 sm:$0xff]  }
   0xb   :  { %177 = vmatpush1.bf16.msra.mxu1 %v1665_v6  ;;  %1055 = vmatpush1.bf16.msra.mxu0 %v1687_v16  ;;  %v1698_v27 = vld [vmem:[%s2481_s3 + $0x2e4] ss:$16 sps:$4 sm:$0xff]   ;;  %v1696_v30 = vld [vmem:[%s2481_s3 + $0x2e0] ss:$16 sps:$4 sm:$0xff]  }
   0xc   :  { %178 = vmatprep.subr.bf16.mxu1 %v1666_v7  ;;  %1056 = vmatprep.subr.bf16.mxu0 %v1688_v17  ;;  %v1700_v29 = vld [vmem:[%s2481_s3 + $0x44] ss:$16 sps:$4 sm:$0xff]   ;;  %v1705_v32 = vld [vmem:[%s2481_s3 + $0x40] ss:$16 sps:$4 sm:$0xff]  }
   0xd   :  { %v1704_v31 = vld [vmem:[%s2481_s3 + $0x2c4] ss:$16 sps:$4 sm:$0xff]   ;;  %v1702_v34 = vld [vmem:[%s2481_s3 + $0x2c0] ss:$16 sps:$4 sm:$0xff]  }
   0xe   :  { %v1706_v33 = vld [vmem:[%s2481_s3 + $0x24] ss:$16 sps:$4 sm:$0xff]   ;;  %v1711_v36 = vld [vmem:[%s2481_s3 + $0x20] ss:$16 sps:$4 sm:$0xff]  }
   0xf   :  { %179 = vmatpush1.bf16.msra.mxu1 %v1668_v8  ;;  %1057 = vmatpush1.bf16.msra.mxu0 %v1690_v20  ;;  %v1710_v35 = vld [vmem:[%s2481_s3 + $0x2a4] ss:$16 sps:$4 sm:$0xff]   ;;  %v1708_v38 = vld [vmem:[%s2481_s3 + $0x2a0] ss:$16 sps:$4 sm:$0xff]   ;;  %v55_v20 = vlaneseq }
  0x10   :  { %215 = vmatprep.subr.bf16.mxu1 %v1672_v9  ;;  %1058 = vmatprep.subr.bf16.mxu0 %v1691_v21  ;;  %v1712_v37 = vld [vmem:[%s2481_s3 + $0x4] ss:$16 sps:$4 sm:$0xff]   ;;  %v1717_v40 = vld [vmem:[%s2481_s3] ss:$16 sps:$4 sm:$0xff]  }
  0x11   :  { %v1716_v39 = vld [vmem:[%s2481_s3 + $0x284] ss:$16 sps:$4 sm:$0xff]   ;;  %v1714_v41 = vld [vmem:[%s2481_s3 + $0x280] ss:$16 sps:$4 sm:$0xff]   ;;  %v2192_v21 = vshrl.u32 %v55_v20, 7 }
  0x12   :  { %1484 = vmatmul.mubr.msk.bf16.vlgmr.msra.gmra.mxu1 %vm160_vm0, %v1669_v13  ;;  %v1718_v42 = vld [vmem:[%s2481_s3 + $0x1e4] ss:$16 sps:$4 sm:$0xff]   ;;  %v1723_v44 = vld [vmem:[%s2481_s3 + $0x1e0] ss:$16 sps:$4 sm:$0xff]   ;;  %v1817_v20 = vld [vmem:[%s2481_s3 + $0x268] ss:$16 sps:$4 sm:$0xff]  }
  0x13   :  { %216 = vmatpush1.bf16.msra.mxu1 %v1670_v14  ;;  %239 = vmatprep.mubr.bf16.mxu1 %v1890_v1  ;;  %v1722_v43 = vld [vmem:[%s2481_s3 + $0x264] ss:$16 sps:$4 sm:$0xff]   ;;  %v1720_v46 = vld [vmem:[%s2481_s3 + $0x260] ss:$16 sps:$4 sm:$0xff]  }
  0x14   :  { %217 = vmatprep.subr.bf16.mxu1 %v1675_v15  ;;  %1059 = vmatpush1.bf16.msra.mxu0 %v1693_v24  ;;  %v1724_v45 = vld [vmem:[%s2481_s3 + $0x1c4] ss:$16 sps:$4 sm:$0xff]   ;;  %v1729_v48 = vld [vmem:[%s2481_s3 + $0x1c0] ss:$16 sps:$4 sm:$0xff]   ;;  %v2201_v24 = vsub.s32 0, %v2192_v21 }
  0x15   :  { %1060 = vmatprep.subr.bf16.mxu0 %v1694_v25  ;;  %v1728_v47 = vld [vmem:[%s2481_s3 + $0x244] ss:$16 sps:$4 sm:$0xff]   ;;  %v1726_v50 = vld [vmem:[%s2481_s3 + $0x240] ss:$16 sps:$4 sm:$0xff]  }
  0x16   :  { %v1730_v49 = vld [vmem:[%s2481_s3 + $0x1a4] ss:$16 sps:$4 sm:$0xff]   ;;  %v1735_v52 = vld [vmem:[%s2481_s3 + $0x1a0] ss:$16 sps:$4 sm:$0xff]  }
  0x17   :  { %218 = vmatpush1.bf16.msra.mxu1 %v1673_v18  ;;  %v1734_v51 = vld [vmem:[%s2481_s3 + $0x224] ss:$16 sps:$4 sm:$0xff]   ;;  %v1732_v54 = vld [vmem:[%s2481_s3 + $0x220] ss:$16 sps:$4 sm:$0xff]  }
  0x18   :  { %219 = vmatprep.subr.bf16.mxu1 %v1678_v19  ;;  %1061 = vmatpush1.bf16.msra.mxu0 %v1699_v28  ;;  %v1736_v53 = vld [vmem:[%s2481_s3 + $0x184] ss:$16 sps:$4 sm:$0xff]   ;;  %v1741_v56 = vld [vmem:[%s2481_s3 + $0x180] ss:$16 sps:$4 sm:$0xff]   ;;  %v1795_v19 = vld [vmem:[%s2481_s3 + $0x2ec] ss:$16 sps:$4 sm:$0xff]  }
  0x19   :  { %1062 = vmatprep.subr.bf16.mxu0 %v1700_v29  ;;  %v1740_v55 = vld [vmem:[%s2481_s3 + $0x204] ss:$16 sps:$4 sm:$0xff]   ;;  %v1738_v58 = vld [vmem:[%s2481_s3 + $0x200] ss:$16 sps:$4 sm:$0xff]  }
  0x1a   :  { %v1742_v57 = vld [vmem:[%s2481_s3 + $0x164] ss:$16 sps:$4 sm:$0xff]   ;;  %v1747_v60 = vld [vmem:[%s2481_s3 + $0x160] ss:$16 sps:$4 sm:$0xff]  }
  0x1b   :  { %220 = vmatpush1.bf16.msra.mxu1 %v1676_v22  ;;  %v1746_v59 = vld [vmem:[%s2481_s3 + $0x3e4] ss:$16 sps:$4 sm:$0xff]   ;;  %v1744_v61 = vld [vmem:[%s2481_s3 + $0x3e0] ss:$16 sps:$4 sm:$0xff]   ;;  %v2195_v22 = vsub.s32 1, %v2192_v21 }
  0x1c   :  { %221 = vmatprep.subr.bf16.mxu1 %v1681_v23  ;;  %1063 = vmatpush1.bf16.msra.mxu0 %v1705_v32  ;;  %v1748_v62 = vld [vmem:[%s2481_s3 + $0x144] ss:$16 sps:$4 sm:$0xff]   ;;  %v1750_v0 = vld [vmem:[%s2481_s3 + $0x3c0] ss:$16 sps:$4 sm:$0xff]  }
  0x1d   :  { %1064 = vmatprep.subr.bf16.mxu0 %v1706_v33  ;;  %v1752_v63 = vld [vmem:[%s2481_s3 + $0x3c4] ss:$16 sps:$4 sm:$0xff]   ;;  %v1753_v1 = vld [vmem:[%s2481_s3 + $0x140] ss:$16 sps:$4 sm:$0xff]  }
  0x1e   :  { %v1754_v2 = vld [vmem:[%s2481_s3 + $0x124] ss:$16 sps:$4 sm:$0xff]   ;;  %v1756_v4 = vld [vmem:[%s2481_s3 + $0x3a0] ss:$16 sps:$4 sm:$0xff]  }
  0x1f   :  { %222 = vmatpush1.bf16.msra.mxu1 %v1679_v26  ;;  %v1758_v3 = vld [vmem:[%s2481_s3 + $0x3a4] ss:$16 sps:$4 sm:$0xff]   ;;  %v1759_v5 = vld [vmem:[%s2481_s3 + $0x120] ss:$16 sps:$4 sm:$0xff]  }
  0x20   :  { %1095 = vmatprep.subr.bf16.mxu1 %v1698_v27  ;;  %1065 = vmatpush1.bf16.msra.mxu0 %v1711_v36  ;;  %v1760_v6 = vld [vmem:[%s2481_s3 + $0x104] ss:$16 sps:$4 sm:$0xff]   ;;  %v1762_v8 = vld [vmem:[%s2481_s3 + $0x380] ss:$16 sps:$4 sm:$0xff]  }
  0x21   :  { %1066 = vmatprep.subr.bf16.mxu0 %v1712_v37  ;;  %v1764_v7 = vld [vmem:[%s2481_s3 + $0x384] ss:$16 sps:$4 sm:$0xff]   ;;  %v1765_v9 = vld [vmem:[%s2481_s3 + $0x100] ss:$16 sps:$4 sm:$0xff]  }
  0x22   :  { %1485 = vmatmul.mubr.msk.bf16.vlgmr.msra.gmra.mxu1 %vm160_vm0, %v1669_v13  ;;  %v1768_v10 = vld [vmem:[%s2481_s3 + $0x364] ss:$16 sps:$4 sm:$0xff]   ;;  %v1766_v12 = vld [vmem:[%s2481_s3 + $0x360] ss:$16 sps:$4 sm:$0xff]  }
  0x23   :  { %1096 = vmatpush1.bf16.msra.mxu1 %v1696_v30  ;;  %v1774_v13 = vld [vmem:[%s2481_s3 + $0x344] ss:$16 sps:$4 sm:$0xff]   ;;  %v1772_v14 = vld [vmem:[%s2481_s3 + $0x340] ss:$16 sps:$4 sm:$0xff]  }
  0x24   :  { %1097 = vmatprep.subr.bf16.mxu1 %v1704_v31  ;;  %1067 = vmatpush1.bf16.msra.mxu0 %v1717_v40  ;;  %v1780_v15 = vld [vmem:[%s2481_s3 + $0x324] ss:$16 sps:$4 sm:$0xff]   ;;  %v1778_v16 = vld [vmem:[%s2481_s3 + $0x320] ss:$16 sps:$4 sm:$0xff]   ;;  %v1769_v40 = vld [vmem:[%s2481_s3 + $0xe8] ss:$16 sps:$4 sm:$0xff]  }
  0x25   :  { %1068 = vmatprep.subr.bf16.mxu0 %v1718_v42  ;;  %v1786_v17 = vld [vmem:[%s2481_s3 + $0x304] ss:$16 sps:$4 sm:$0xff]   ;;  %v1784_v18 = vld [vmem:[%s2481_s3 + $0x300] ss:$16 sps:$4 sm:$0xff]   ;;  %v1777_v42 = vld [vmem:[%s2481_s3 + $0xcc] ss:$16 sps:$4 sm:$0xff]  }
  0x26   :  { %v53_v23 = vld [vmem:[%s2482_s2] sm:$0xf] }
  0x27   :  { %1098 = vmatpush1.bf16.msra.mxu1 %v1702_v34  ;;  %v62_v26 = vrot.slane %v53_v23, %v2195_v22  ;;  %v58_v27 = vrot.slane %v53_v23, %v2201_v24 }
  0x28   :  { %1099 = vmatprep.subr.bf16.mxu1 %v1710_v35  ;;  %1069 = vmatpush2.bf16.msra.mxu0 %v1723_v44  ;;  %v65_v44 = vsub.s32 2, %v2192_v21 }
  0x29   :  { %1070 = vmatprep.subr.bf16.mxu0 %v1724_v45  ;;  %v1775_v45 = vld [vmem:[%s2481_s3 + $0xc8] ss:$16 sps:$4 sm:$0xff]  }
  0x2b   :  { %1100 = vmatpush1.bf16.msra.mxu1 %v1708_v38 }
  0x2c   :  { %1101 = vmatprep.subr.bf16.mxu1 %v1716_v39  ;;  %1071 = vmatpush2.bf16.msra.mxu0 %v1729_v48 }
  0x2d   :  { %1072 = vmatprep.subr.bf16.mxu0 %v1730_v49  ;;  %v66_v49 = vrot.slane %v53_v23, %v65_v44 }
  0x2f   :  { %1102 = vmatpush1.bf16.msra.mxu1 %v1714_v41 }
  0x30   :  { %1103 = vmatprep.subr.bf16.mxu1 %v1722_v43  ;;  %1073 = vmatpush2.bf16.msra.mxu0 %v1735_v52  ;;  %v69_v43 = vsub.s32 3, %v2192_v21 }
  0x31   :  { %1074 = vmatprep.subr.bf16.mxu0 %v1736_v53  ;;  %v1789_v53 = vld [vmem:[%s2481_s3 + $0x8c] ss:$16 sps:$4 sm:$0xff]  }
  0x32   :  { %v70_v48 = vrot.slane %v53_v23, %v69_v43  ;;  %v1822_v23 = vld [vmem:[%s2481_s3 + $0x1cc] ss:$16 sps:$4 sm:$0xff]  }
  0x33   :  { %1104 = vmatpush1.bf16.msra.mxu1 %v1720_v46 }
  0x34   :  { %1105 = vmatprep.subr.bf16.mxu1 %v1728_v47  ;;  %1075 = vmatpush2.bf16.msra.mxu0 %v1741_v56  ;;  %v1783_v47 = vld [vmem:[%s2481_s3 + $0xac] ss:$16 sps:$4 sm:$0xff]  }
  0x35   :  { %1076 = vmatprep.subr.bf16.mxu0 %v1742_v57 }
  0x37   :  { %1106 = vmatpush1.bf16.msra.mxu1 %v1726_v50 }
  0x38   :  { %1107 = vmatprep.subr.bf16.mxu1 %v1734_v51  ;;  %1077 = vmatpush2.bf16.msra.mxu0 %v1747_v60  ;;  %v1781_v51 = vld [vmem:[%s2481_s3 + $0xa8] ss:$16 sps:$4 sm:$0xff]  }
  0x39   :  { %1078 = vmatprep.subr.bf16.mxu0 %v1748_v62 }
  0x3b   :  { %1108 = vmatpush1.bf16.msra.mxu1 %v1732_v54 }
  0x3c   :  { %1109 = vmatprep.subr.bf16.mxu1 %v1740_v55  ;;  %1079 = vmatpush2.bf16.msra.mxu0 %v1753_v1 }
  0x3d   :  { %1080 = vmatprep.subr.bf16.mxu0 %v1754_v2  ;;  %v1790_v2 = vld [vmem:[%s2481_s3 + $0x68] ss:$16 sps:$4 sm:$0xff]  }
  0x3f   :  { %1110 = vmatpush1.bf16.msra.mxu1 %v1738_v58 }
  0x40   :  { %1111 = vmatprep.subr.bf16.mxu1 %v1746_v59  ;;  %1081 = vmatpush2.bf16.msra.mxu0 %v1759_v5  ;;  %v1787_v59 = vld [vmem:[%s2481_s3 + $0x88] ss:$16 sps:$4 sm:$0xff]   ;;  %v1798_v5 = vld [vmem:[%s2481_s3 + $0x4c] ss:$16 sps:$4 sm:$0xff]  }
  0x41   :  { %1082 = vmatprep.subr.bf16.mxu0 %v1760_v6  ;;  %v1801_v6 = vld [vmem:[%s2481_s3 + $0x2cc] ss:$16 sps:$4 sm:$0xff]  }
  0x43   :  { %1112 = vmatpush2.bf16.msra.mxu1 %v1744_v61  ;;  %v1792_v61 = vld [vmem:[%s2481_s3 + $0x6c] ss:$16 sps:$4 sm:$0xff]  }
  0x44   :  { %1113 = vmatprep.subr.bf16.mxu1 %v1752_v63  ;;  %1083 = vmatpush2.bf16.msra.mxu0 %v1765_v9  ;;  %v1804_v9 = vld [vmem:[%s2481_s3 + $0x2c] ss:$16 sps:$4 sm:$0xff]  }
  0x45   :  { %1138 = vmatprep.subr.bf16.mxu0 %v1771_v11  ;;  %v1802_v11 = vld [vmem:[%s2481_s3 + $0x28] ss:$16 sps:$4 sm:$0xff]  }
  0x47   :  { %1114 = vmatpush2.bf16.msra.mxu1 %v1750_v0 }
  0x48   :  { %1115 = vmatprep.subr.bf16.mxu1 %v1758_v3  ;;  %v1793_v3 = vld [vmem:[%s2481_s3 + $0x2e8] ss:$16 sps:$4 sm:$0xff]  }
  0x4b   :  { %1116 = vmatpush2.bf16.msra.mxu1 %v1756_v4 }
  0x4c   :  { %1117 = vmatprep.subr.bf16.mxu1 %v1764_v7  ;;  %v1796_v7 = vld [vmem:[%s2481_s3 + $0x48] ss:$16 sps:$4 sm:$0xff]  }
  0x4f   :  { %1118 = vmatpush2.bf16.msra.mxu1 %v1762_v8  ;;  %v1799_v8 = vld [vmem:[%s2481_s3 + $0x2c8] ss:$16 sps:$4 sm:$0xff]  }
  0x50   :  { %1119 = vmatprep.subr.bf16.mxu1 %v1768_v10  ;;  %v1807_v10 = vld [vmem:[%s2481_s3 + $0x2ac] ss:$16 sps:$4 sm:$0xff]  }
  0x53   :  { %1120 = vmatpush2.bf16.msra.mxu1 %v1766_v12  ;;  %v1805_v12 = vld [vmem:[%s2481_s3 + $0x2a8] ss:$16 sps:$4 sm:$0xff]  }
  0x54   :  { %1121 = vmatprep.subr.bf16.mxu1 %v1774_v13  ;;  %v1810_v13 = vld [vmem:[%s2481_s3 + $0xc] ss:$16 sps:$4 sm:$0xff]  }
  0x57   :  { %1122 = vmatpush2.bf16.msra.mxu1 %v1772_v14  ;;  %v1813_v14 = vld [vmem:[%s2481_s3 + $0x28c] ss:$16 sps:$4 sm:$0xff]  }
  0x58   :  { %1123 = vmatprep.subr.bf16.mxu1 %v1780_v15  ;;  %v1808_v15 = vld [vmem:[%s2481_s3 + $0x8] ss:$16 sps:$4 sm:$0xff]  }
  0x5b   :  { %1124 = vmatpush2.bf16.msra.mxu1 %v1778_v16  ;;  %v1811_v16 = vld [vmem:[%s2481_s3 + $0x288] ss:$16 sps:$4 sm:$0xff]  }
  0x5c   :  { %1125 = vmatprep.subr.bf16.mxu1 %v1786_v17  ;;  %v1816_v17 = vld [vmem:[%s2481_s3 + $0x1ec] ss:$16 sps:$4 sm:$0xff]  }
  0x5f   :  { %1126 = vmatpush2.bf16.msra.mxu1 %v1784_v18  ;;  %v1819_v18 = vld [vmem:[%s2481_s3 + $0x26c] ss:$16 sps:$4 sm:$0xff]  }
  0x60   :  { %1181 = vmatprep.subr.bf16.mxu1 %v1795_v19  ;;  %v1814_v19 = vld [vmem:[%s2481_s3 + $0x1e8] ss:$16 sps:$4 sm:$0xff]  }
  0xd2   :  { %v198_v25 = vpop.f32.mrf.mxu1 }
  0xd3   :  { %v199_v32 = vadd.f32 %v198_v25, %v58_v27  ;;  %v1825_v25 = vld [vmem:[%s2481_s3 + $0x24c] ss:$16 sps:$4 sm:$0xff]  }
  0xd4   :  { %v200_v28 = vpop.f32.mrf.mxu1 }
  0xd5   :  { %v201_v30 = vadd.f32 %v200_v28, %v62_v26  ;;  %v250_v38 = vmax.f32 %v199_v32, 0.0  ;;  %v1828_v28 = vld [vmem:[%s2481_s3 + $0x1ac] ss:$16 sps:$4 sm:$0xff]  }
  0xd6   :  { %v202_v29 = vpop.f32.mrf.mxu1  ;;  %v1834_v32 = vld [vmem:[%s2481_s3 + $0x18c] ss:$16 sps:$4 sm:$0xff]  }
  0xd7   :  { %v203_v31 = vadd.f32 %v202_v29, %v58_v27  ;;  %v251_v36 = vmax.f32 %v201_v30, 0.0  ;;  %v1823_v27 = vld [vmem:[%s2481_s3 + $0x248] ss:$16 sps:$4 sm:$0xff]   ;;  %v1831_v29 = vld [vmem:[%s2481_s3 + $0x22c] ss:$16 sps:$4 sm:$0xff]  }
  0xd8   :  { %v204_v33 = vpop.f32.mrf.mxu1  ;;  %v1826_v30 = vld [vmem:[%s2481_s3 + $0x1a8] ss:$16 sps:$4 sm:$0xff]  }
  0xd9   :  { %v205_v34 = vadd.f32 %v204_v33, %v62_v26  ;;  %v254_v35 = vmax.f32 %v203_v31, 0.0  ;;  %v1820_v26 = vld [vmem:[%s2481_s3 + $0x1c8] ss:$16 sps:$4 sm:$0xff]   ;;  %v1837_v33 = vld [vmem:[%s2481_s3 + $0x20c] ss:$16 sps:$4 sm:$0xff]  }
  0xda   :  { %v1829_v31 = vld [vmem:[%s2481_s3 + $0x228] ss:$16 sps:$4 sm:$0xff]  }
  0xdb   :  { %v255_v37 = vmax.f32 %v205_v34, 0.0  ;;  %v2208_v41 = vpack.c.bf16 %v254_v35, %v250_v38  ;;  %v1832_v34 = vld [vmem:[%s2481_s3 + $0x188] ss:$16 sps:$4 sm:$0xff]  }
  0xdc   :  { %v1835_v35 = vld [vmem:[%s2481_s3 + $0x208] ss:$16 sps:$4 sm:$0xff]  }
  0xdd   :  { %v259_v39 = vpack.c.bf16 %v255_v37, %v251_v36  ;;  %v1840_v36 = vld [vmem:[%s2481_s3 + $0x16c] ss:$16 sps:$4 sm:$0xff]   ;;  %v1838_v38 = vld [vmem:[%s2481_s3 + $0x168] ss:$16 sps:$4 sm:$0xff]  }
  0xde   :  { %v1843_v37 = vld [vmem:[%s2481_s3 + $0x3ec] ss:$16 sps:$4 sm:$0xff]  }
  0xdf   :  { %1084 = vmatprep.mubr.bf16.mxu0 %v259_v39 }
  0xe0   :  { %1085 = vmatmul.mubr.bf16.vlgmr.msra.gmra.mxu0 %v2208_v41 }
  0xe1   :  { %1139 = vmatpush1.bf16.msra.mxu0 %v1769_v40  ;;  %1170 = vmatprep.mubr.bf16.mxu0 %v259_v39  ;;  %v1841_v39 = vld [vmem:[%s2481_s3 + $0x3e8] ss:$16 sps:$4 sm:$0xff]   ;;  %v1846_v40 = vld [vmem:[%s2481_s3 + $0x14c] ss:$16 sps:$4 sm:$0xff]  }
  0xe2   :  { %v241_v46 = vpop.f32.mrf.mxu1  ;;  %1140 = vmatprep.subr.bf16.mxu0 %v1777_v42  ;;  %v1849_v42 = vld [vmem:[%s2481_s3 + $0x3cc] ss:$16 sps:$4 sm:$0xff]  }
  0xe3   :  { %v242_v56 = vadd.f32 %v241_v46, %v66_v49  ;;  %v1847_v46 = vld [vmem:[%s2481_s3 + $0x3c8] ss:$16 sps:$4 sm:$0xff]  }
  0xe4   :  { %v243_v50 = vpop.f32.mrf.mxu1 }
  0xe5   :  { %1141 = vmatpush1.bf16.msra.mxu0 %v1775_v45  ;;  %v244_v54 = vadd.f32 %v243_v50, %v70_v48  ;;  %v252_v0 = vmax.f32 %v242_v56, 0.0  ;;  %v1844_v45 = vld [vmem:[%s2481_s3 + $0x148] ss:$16 sps:$4 sm:$0xff]  }
  0xe6   :  { %v245_v52 = vpop.f32.mrf.mxu1  ;;  %1142 = vmatprep.subr.bf16.mxu0 %v1783_v47  ;;  %v1852_v47 = vld [vmem:[%s2481_s3 + $0x12c] ss:$16 sps:$4 sm:$0xff]   ;;  %v1853_v50 = vld [vmem:[%s2481_s3 + $0x3a8] ss:$16 sps:$4 sm:$0xff]  }
  0xe7   :  { %v246_v55 = vadd.f32 %v245_v52, %v66_v49  ;;  %v253_v62 = vmax.f32 %v244_v54, 0.0  ;;  %v1850_v49 = vld [vmem:[%s2481_s3 + $0x128] ss:$16 sps:$4 sm:$0xff]   ;;  %v1861_v52 = vld [vmem:[%s2481_s3 + $0x38c] ss:$16 sps:$4 sm:$0xff]  }
  0xe8   :  { %v247_v57 = vpop.f32.mrf.mxu1  ;;  %v1859_v54 = vld [vmem:[%s2481_s3 + $0x388] ss:$16 sps:$4 sm:$0xff]  }
  0xe9   :  { %v248_v58 = vadd.f32 %v247_v57, %v70_v48  ;;  %1143 = vmatpush1.bf16.msra.mxu0 %v1781_v51  ;;  %v256_v60 = vmax.f32 %v246_v55, 0.0  ;;  %v1855_v48 = vld [vmem:[%s2481_s3 + $0x3ac] ss:$16 sps:$4 sm:$0xff]   ;;  %v1862_v56 = vld [vmem:[%s2481_s3 + $0x368] ss:$16 sps:$4 sm:$0xff]  }
  0xea   :  { %1144 = vmatprep.subr.bf16.mxu0 %v1789_v53  ;;  %v1858_v51 = vld [vmem:[%s2481_s3 + $0x10c] ss:$16 sps:$4 sm:$0xff]   ;;  %v1856_v53 = vld [vmem:[%s2481_s3 + $0x108] ss:$16 sps:$4 sm:$0xff]  }
  0xeb   :  { %v257_v63 = vmax.f32 %v248_v58, 0.0  ;;  %v2244_v4 = vpack.c.bf16 %v256_v60, %v252_v0  ;;  %v1864_v55 = vld [vmem:[%s2481_s3 + $0x36c] ss:$16 sps:$4 sm:$0xff]   ;;  %v1865_v58 = vld [vmem:[%s2481_s3 + $0x348] ss:$16 sps:$4 sm:$0xff]   ;;  %v1876_v0 = vld [vmem:[%s2483_s7 + $0x70] sm:$0xff]  }
  0xec   :  { %v1867_v57 = vld [vmem:[%s2481_s3 + $0x34c] ss:$16 sps:$4 sm:$0xff]   ;;  %v1868_v60 = vld [vmem:[%s2481_s3 + $0x328] ss:$16 sps:$4 sm:$0xff]  }
  0xed   :  { %v261_v1 = vpack.c.bf16 %v257_v63, %v253_v62  ;;  %1145 = vmatpush1.bf16.msra.mxu0 %v1787_v59  ;;  %v1870_v59 = vld [vmem:[%s2481_s3 + $0x32c] ss:$16 sps:$4 sm:$0xff]  }
  0xee   :  { %1146 = vmatprep.subr.bf16.mxu0 %v1792_v61  ;;  %v1871_v61 = vld [vmem:[%s2481_s3 + $0x308] ss:$16 sps:$4 sm:$0xff]  }
  0xef   :  { %1127 = vmatprep.mubr.bf16.mxu1 %v261_v1  ;;  %v1874_v62 = vld [vmem:[%s2483_s7 + $0x78] sm:$0xff]  }
  0xf0   :  { %1128 = vmatmul.mubr.bf16.vlgmr.msra.gmra.mxu1 %v2244_v4  ;;  %v1875_v63 = vld [vmem:[%s2483_s7 + $0x38] sm:$0xff]  }
  0xf1   :  { %1147 = vmatpush1.bf16.msra.mxu0 %v1790_v2  ;;  %1182 = vmatpush1.bf16.msra.mxu1 %v1793_v3  ;;  %v1878_v2 = vld [vmem:[%s2483_s7 + $0x68] sm:$0xff]  }
  0xf2   :  { %1213 = vmatprep.mubr.bf16.mxu1 %v261_v1  ;;  %1148 = vmatprep.subr.bf16.mxu0 %v1798_v5  ;;  %v1877_v1 = vld [vmem:[%s2483_s7 + $0x30] sm:$0xff]   ;;  %v1879_v3 = vld [vmem:[%s2483_s7 + $0x28] sm:$0xff]   ;;  %v1881_v5 = vld [vmem:[%s2483_s7 + $0x20] sm:$0xff]  }
  0xf3   :  { %1183 = vmatprep.subr.bf16.mxu1 %v1801_v6  ;;  %v1882_v6 = vld [vmem:[%s2483_s7 + $0x58] sm:$0xff]  }
  0xf5   :  { %1149 = vmatpush1.bf16.msra.mxu0 %v1796_v7  ;;  %1184 = vmatpush1.bf16.msra.mxu1 %v1799_v8  ;;  %v1883_v7 = vld [vmem:[%s2483_s7 + $0x18] sm:$0xff]   ;;  %v1884_v8 = vld [vmem:[%s2483_s7 + $0x50] sm:$0xff]  }
  0xf6   :  { %1150 = vmatprep.subr.bf16.mxu0 %v1804_v9  ;;  %1185 = vmatprep.subr.bf16.mxu1 %v1807_v10  ;;  %v1885_v9 = vld [vmem:[%s2483_s7 + $0x10] sm:$0xff]   ;;  %v1886_v10 = vld [vmem:[%s2483_s7 + $0x48] sm:$0xff]  }
  0xf9   :  { %1151 = vmatpush1.bf16.msra.mxu0 %v1802_v11  ;;  %1186 = vmatpush1.bf16.msra.mxu1 %v1805_v12  ;;  %v1887_v11 = vld [vmem:[%s2483_s7 + $0x8] sm:$0xff]   ;;  %v1888_v12 = vld [vmem:[%s2483_s7 + $0x40] sm:$0xff]  }
  0xfa   :  { %1152 = vmatprep.subr.bf16.mxu0 %v1810_v13  ;;  %1187 = vmatprep.subr.bf16.mxu1 %v1813_v14  ;;  %v1889_v13 = vld [vmem:[%s2483_s7] sm:$0xff]   ;;  %v14_v14 = vstv %s2484_s6 }
  0xfb   :  { %15 = vst [vmem:[#allocation2] sm:$0x1] %v14_v14 }
  0xfd   :  { %1153 = vmatpush1.bf16.msra.mxu0 %v1808_v15  ;;  %1188 = vmatpush1.bf16.msra.mxu1 %v1811_v16  ;;  %v390_v16 = vld [vmem:[%s2485_s4] sm:$0xf] }
  0xfe   :  { %1154 = vmatprep.subr.bf16.mxu0 %v1816_v17  ;;  %1189 = vmatprep.subr.bf16.mxu1 %v1819_v18  ;;  %v395_v18 = vrot.slane %v390_v16, %v2201_v24 }
 0x101   :  { %1155 = vmatpush2.bf16.msra.mxu0 %v1814_v19  ;;  %1190 = vmatpush1.bf16.msra.mxu1 %v1817_v20  ;;  %v399_v19 = vrot.slane %v390_v16, %v2195_v22 }
 0x102   :  { %1156 = vmatprep.subr.bf16.mxu0 %v1822_v23  ;;  %1191 = vmatprep.subr.bf16.mxu1 %v1825_v25  ;;  %v1232_v25 = vld [vmem:[%s2486_s5] sm:$0x3] }
 0x105   :  { %1157 = vmatpush2.bf16.msra.mxu0 %v1820_v26  ;;  %1192 = vmatpush1.bf16.msra.mxu1 %v1823_v27 }
 0x106   :  { %1158 = vmatprep.subr.bf16.mxu0 %v1828_v28  ;;  %1193 = vmatprep.subr.bf16.mxu1 %v1831_v29 }
 0x109   :  { %1159 = vmatpush2.bf16.msra.mxu0 %v1826_v30  ;;  %1194 = vmatpush1.bf16.msra.mxu1 %v1829_v31  ;;  %v1237_v31 = vrot.slane %v1232_v25, %v2201_v24 }
 0x10a   :  { %1160 = vmatprep.subr.bf16.mxu0 %v1834_v32  ;;  %1195 = vmatprep.subr.bf16.mxu1 %v1837_v33 }
 0x10d   :  { %1161 = vmatpush2.bf16.msra.mxu0 %v1832_v34  ;;  %1196 = vmatpush1.bf16.msra.mxu1 %v1835_v35  ;;  %v1241_v35 = vrot.slane %v1232_v25, %v2195_v22  ;;  %v407_v22 = vrot.slane %v390_v16, %v69_v43 }
 0x10e   :  { %1162 = vmatprep.subr.bf16.mxu0 %v1840_v36  ;;  %1197 = vmatprep.subr.bf16.mxu1 %v1843_v37 }
 0x111   :  { %1163 = vmatpush2.bf16.msra.mxu0 %v1838_v38  ;;  %1198 = vmatpush2.bf16.msra.mxu1 %v1841_v39 }
 0x112   :  { %1164 = vmatprep.subr.bf16.mxu0 %v1846_v40  ;;  %1199 = vmatprep.subr.bf16.mxu1 %v1849_v42 }
 0x115   :  { %1165 = vmatpush2.bf16.msra.mxu0 %v1844_v45  ;;  %1200 = vmatpush2.bf16.msra.mxu1 %v1847_v46 }
 0x116   :  { %1166 = vmatprep.subr.bf16.mxu0 %v1852_v47  ;;  %1201 = vmatprep.subr.bf16.mxu1 %v1855_v48 }
 0x119   :  { %1167 = vmatpush2.bf16.msra.mxu0 %v1850_v49  ;;  %1202 = vmatpush2.bf16.msra.mxu1 %v1853_v50 }
 0x11a   :  { %1168 = vmatprep.subr.bf16.mxu0 %v1858_v51  ;;  %1203 = vmatprep.subr.bf16.mxu1 %v1861_v52 }
 0x11d   :  { %1169 = vmatpush2.bf16.msra.mxu0 %v1856_v53  ;;  %1204 = vmatpush2.bf16.msra.mxu1 %v1859_v54 }
 0x11e   :  { %1205 = vmatprep.subr.bf16.mxu1 %v1864_v55  ;;  %1632 = vmatprep.subr.bf16.mxu0 %v1874_v62  ;;  %v403_v55 = vrot.slane %v390_v16, %v65_v44  ;;  %v1614_v44 = vld [vmem:[#allocation2] ss:$0 sm:$0xff] }
 0x120   :  { %1171 = vmatmul.mubr.bf16.vlgmr.msra.gmra.mxu0 %v2208_v41  ;;  %v1873_v41 = vld [vmem:[%s2481_s3 + $0x30c] ss:$16 sps:$4 sm:$0xff]  }
 0x121   :  { %1206 = vmatpush2.bf16.msra.mxu1 %v1862_v56  ;;  %1633 = vmatpush3.bf16.msra.mxu0 %v1875_v63 }
 0x122   :  { %1207 = vmatprep.subr.bf16.mxu1 %v1867_v57  ;;  %1634 = vmatprep.subr.bf16.mxu0 %v1876_v0 }
 0x125   :  { %1208 = vmatpush2.bf16.msra.mxu1 %v1865_v58  ;;  %1635 = vmatpush3.bf16.msra.mxu0 %v1877_v1 }
 0x126   :  { %1209 = vmatprep.subr.bf16.mxu1 %v1870_v59  ;;  %1636 = vmatprep.subr.bf16.mxu0 %v1878_v2 }
 0x129   :  { %1210 = vmatpush2.bf16.msra.mxu1 %v1868_v60  ;;  %1637 = vmatpush3.bf16.msra.mxu0 %v1879_v3 }
 0x12a   :  { %1211 = vmatprep.subr.bf16.mxu1 %v1873_v41 }
 0x12d   :  { %1212 = vmatpush2.bf16.msra.mxu1 %v1871_v61 }
 0x130   :  { %1214 = vmatmul.mubr.bf16.vlgmr.msra.gmra.mxu1 %v2244_v4  ;;  %v1880_v4 = vld [vmem:[%s2483_s7 + $0x60] sm:$0xff]  }
 0x131   :  { %1638 = vmatprep.subr.bf16.mxu0 %v1880_v4 }
 0x132   :  { %1639 = vmatpush3.bf16.msra.mxu0 %v1881_v5 }
 0x133   :  { %1640 = vmatprep.subr.bf16.mxu0 %v1882_v6 }
 0x136   :  { %1641 = vmatpush3.bf16.msra.mxu0 %v1883_v7 }
 0x137   :  { %1642 = vmatprep.subr.bf16.mxu0 %v1884_v8 }
 0x13a   :  { %1643 = vmatpush3.bf16.msra.mxu0 %v1885_v9 }
 0x13b   :  { %1644 = vmatprep.subr.bf16.mxu0 %v1886_v10 }
 0x13e   :  { %1645 = vmatpush3.bf16.msra.mxu0 %v1887_v11 }
 0x13f   :  { %1646 = vmatprep.subr.bf16.mxu0 %v1888_v12  ;;  %v1615_v12 = vld [vmem:[%s2487_s8] ss:$0 sm:$0xff] }
 0x142   :  { %1647 = vmatpush3.bf16.msra.mxu0 %v1889_v13 }
 0x1a0   :  { %v1086_v15 = vpop.f32.mrf.mxu0 }
 0x1a1   :  { %v1087_v23 = vadd.f32 %v1086_v15, %v395_v18 }
 0x1a2   :  { %v1088_v17 = vpop.f32.mrf.mxu0 }
 0x1a3   :  { %v1089_v27 = vadd.f32 %v1088_v17, %v399_v19 }
 0x1a4   :  { %v1090_v20 = vpop.f32.mrf.mxu0 }
 0x1a5   :  { %v1091_v32 = vadd.f32 %v1090_v20, %v395_v18 }
 0x1a6   :  { %v1092_v29 = vpop.f32.mrf.mxu0 }
 0x1a7   :  { %v1093_v37 = vadd.f32 %v1092_v29, %v399_v19 }
 0x1b0   :  { %v1129_v26 = vpop.f32.mrf.mxu1 }
 0x1b1   :  { %v1130_v28 = vadd.f32 %v1129_v26, %v1087_v23 }
 0x1b2   :  { %v1131_v30 = vpop.f32.mrf.mxu1 }
 0x1b3   :  { %v1224_v33 = vmax.f32 %v1130_v28, 0.0  ;;  %v1132_v34 = vadd.f32 %v1131_v30, %v1089_v27 }
 0x1b4   :  { %v1133_v36 = vpop.f32.mrf.mxu1 }
 0x1b5   :  { %v1225_v38 = vmax.f32 %v1132_v34, 0.0  ;;  %v1134_v39 = vadd.f32 %v1133_v36, %v1091_v32  ;;  %v1244_v46 = vmul.f32 %v1237_v31, %v1224_v33 }
 0x1b6   :  { %v1135_v40 = vpop.f32.mrf.mxu1 }
 0x1b7   :  { %v1228_v42 = vmax.f32 %v1134_v39, 0.0  ;;  %v1136_v45 = vadd.f32 %v1135_v40, %v1093_v37  ;;  %v1245_v47 = vmul.f32 %v1241_v35, %v1225_v38 }
 0x1b9   :  { %v1229_v48 = vmax.f32 %v1136_v45, 0.0  ;;  %v1248_v49 = vadd.f32 %v1245_v47, %v1244_v46  ;;  %v1246_v50 = vmul.f32 %v1237_v31, %v1228_v42 }
 0x1bb   :  { %v1247_v51 = vmul.f32 %v1241_v35, %v1229_v48  ;;  %1249 = vadd.xlane.f32.xlu0 %v1248_v49 }
 0x1bd   :  { %v1251_v24 = vadd.f32 %v1247_v51, %v1246_v50 }
 0x1bf   :  { %1252 = vadd.xlane.f32.xlu0 %v1251_v24 }
 0x1e0   :  { %v1172_v52 = vpop.f32.mrf.mxu0 }
 0x1e1   :  { %v1173_v41 = vadd.f32 %v1172_v52, %v403_v55 }
 0x1e2   :  { %v1174_v53 = vpop.f32.mrf.mxu0 }
 0x1e3   :  { %v1175_v59 = vadd.f32 %v1174_v53, %v407_v22 }
 0x1e4   :  { %v1176_v54 = vpop.f32.mrf.mxu0 }
 0x1e5   :  { %v1177_v60 = vadd.f32 %v1176_v54, %v403_v55 }
 0x1e6   :  { %v1178_v57 = vpop.f32.mrf.mxu0 }
 0x1e7   :  { %v1179_v62 = vadd.f32 %v1178_v57, %v407_v22 }
 0x1f0   :  { %v1215_v56 = vpop.f32.mrf.mxu1 }
 0x1f1   :  { %v1216_v1 = vadd.f32 %v1215_v56, %v1173_v41 }
 0x1f2   :  { %v1217_v58 = vpop.f32.mrf.mxu1 }
 0x1f3   :  { %v1218_v63 = vadd.f32 %v1217_v58, %v1175_v59  ;;  %v1226_v43 = vmax.f32 %v1216_v1, 0.0 }
 0x1f4   :  { %v1219_v61 = vpop.f32.mrf.mxu1 }
 0x1f5   :  { %v1220_v0 = vadd.f32 %v1219_v61, %v1177_v60  ;;  %v1227_v5 = vmax.f32 %v1218_v63, 0.0 }
 0x1f6   :  { %v1221_v2 = vpop.f32.mrf.mxu1 }
 0x1f7   :  { %v1222_v3 = vadd.f32 %v1221_v2, %v1179_v62  ;;  %v1230_v4 = vmax.f32 %v1220_v0, 0.0 }
 0x1f9   :  { %v1231_v6 = vmax.f32 %v1222_v3, 0.0  ;;  %v1263_v21 = vpack.c.bf16 %v1230_v4, %v1226_v43 }
 0x1fb   :  { %v1264_v7 = vpack.c.bf16 %v1231_v6, %v1227_v5 }
 0x1fd   :  { %1432 = vmatprep.mubr.bf16.mxu0 %v1264_v7 }
 0x1fe   :  { %1433 = vmatmul.mubr.bf16.vlgmr.msra.gmra.mxu0 %v1263_v21 }
 0x244   :  { %v1250_v8 = vpop.xlane.xlu0 %1249 }
 0x245   :  { %v1261_v9 = vadd.f32 %v1614_v44, %v1250_v8 }
 0x247   :  { %1449 = vperm.xlu0 %1655, %v1261_v9  }
 0x248   :  { %v1253_v19 = vpop.xlane.xlu0 %1252 }
 0x249   :  { %v1262_v20 = vadd.f32 %v1614_v44, %v1253_v19 }
 0x2be   :  { %v1648_v10 = vpop.f32.mrf.mxu0 }
 0x2c0   :  { %v1649_v11 = vpop.f32.mrf.mxu0 }
 0x2c1   :  { %v1650_v13 = vadd.f32 %v1649_v11, %v1648_v10 }
 0x2c2   :  { %v1651_v14 = vpop.f32.mrf.mxu0  ;;  %v1450_v23 = vpop.permute.xlu0 %1449 }
 0x2c3   :  { %v1435_v15 = vadd.f32 %v1650_v13, %v1615_v12 }
 0x2c4   :  { %v1652_v16 = vpop.f32.mrf.mxu0 }
 0x2c5   :  { %v1653_v17 = vadd.f32 %v1652_v16, %v1651_v14  ;;  %1441 = vadd.xlane.f32.xlu1 %v1435_v15  ;;  %v1457_v26 = vadd.f32 %v1450_v23, %v1435_v15 }
 0x2c7   :  { %v1438_v18 = vadd.f32 %v1653_v17, %v1615_v12 }
 0x2c9   :  { %1443 = vadd.xlane.f32.xlu1 %v1438_v18 }
 0x2da   :  { %1454 = vperm.xlu1 %1656, %v1262_v20  }
 0x34e   :  { %v1442_v25 = vpop.xlane.xlu1 %1441 }
 0x34f   :  { %v1445_v27 = vmul.f32 0.16666667, %v1442_v25 }
 0x351   :  { %v1459_v28 = vsub.f32 %v1457_v26, %v1445_v27 }
 0x352   :  { %v1444_v29 = vpop.xlane.xlu1 %1443 }
 0x353   :  { %1461 = vst [vmem:[%s2488_s9] sm:$0xff] %v1459_v28  ;;  %v1446_v31 = vmul.f32 0.16666667, %v1444_v29 }
 0x356   :  { %v1455_v30 = vpop.permute.xlu1 %1454 }
 0x357   :  { %v1458_v32 = vadd.f32 %v1455_v30, %v1438_v18 }
 0x359   :  { %v1460_v33 = vsub.f32 %v1458_v32, %v1446_v31 }
 0x35b   :  { %1462 = vst [vmem:[%s2488_s9 + $0x8] sm:$0xff] %v1460_v33 }

</bundles_post_ra>
